<compile_context>
chip_gen: v6e
topology: v6e:2x2x1
jax: 0.10.0
libtpu: 0.0.40
codegen_flags: <defaults>
</compile_context>

<pallas_src>
import functools

import jax
import jax.numpy as jnp
import numpy as np
from jax.experimental import pallas as pl
from jax.experimental.pallas import tpu as pltpu


# ----------------------------------------------------------------------------- kernel
def _ds_msa_layer_kernel(x_ref, a2_ref, maskc_ref, sel_ref, selT_ref, gsum_ref,
                         w_ref, w2_ref, vec_ref, relb_ref, o_ref,
                         *, N, C, H, R, MLP, scale, eps):
    """grid=(B, DEPTH): one (batch, layer) step; activation lives in o_ref (VMEM)."""
    d = pl.program_id(1)

    @pl.when(d == 0)
    def _():                                   # seed the residual stream for this batch
        o_ref[...] = x_ref[...]

    y = o_ref[...]                             # (N, C) f32 residual stream
    y_bf = y.astype(jnp.bfloat16)

    # Static column offsets into the packed per-layer slabs.
    # w_ref   : (C, 4C+MLP)  bf16  = [wq | wk | wv | wproj | w1]
    # vec_ref : (1, 4C+MLP)  f32   = [bproj | ln_g | ln_b | b2 | b1]
    wq, wk, wv = w_ref[:, 0:C], w_ref[:, C:2 * C], w_ref[:, 2 * C:3 * C]
    wproj, w1 = w_ref[:, 3 * C:4 * C], w_ref[:, 4 * C:4 * C + MLP]
    bproj, ln_g = vec_ref[:, 0:C], vec_ref[:, C:2 * C]
    ln_b, b2, b1 = vec_ref[:, 2 * C:3 * C], vec_ref[:, 3 * C:4 * C], vec_ref[:, 4 * C:4 * C + MLP]

    # ---------------- SpatialAttention + residual ----------------
    # pre_kv[n*R+r, c] = sum_m assignment[n, m, r] * y[m, c]    (per-batch aggregation)
    pre_kv = jnp.dot(a2_ref[...], y_bf, preferred_element_type=jnp.float32)   # (N*R, C)
    pre_bf = pre_kv.astype(jnp.bfloat16)

    q = jnp.dot(y_bf, wq, preferred_element_type=jnp.float32)                 # (N, C)
    k = jnp.dot(pre_bf, wk, preferred_element_type=jnp.float32)               # (N*R, C)
    v = jnp.dot(pre_bf, wv, preferred_element_type=jnp.float32)               # (N*R, C)

    # QK scores: the per-head dh-reduction runs on the MXU via the 0/1 selector (C, H).
    prod = (k.reshape(N, R, C) * q.reshape(N, 1, C)).reshape(N * R, C)
    logits = jnp.dot(prod.astype(jnp.bfloat16), sel_ref[...],
                     preferred_element_type=jnp.float32) * scale              # (N*R, H)
    logits = logits + maskc_ref[...]                       # additive -1e30 mask, bcast over H
    logits = logits.reshape(N, R, H) + relb_ref[...][None, :, :]              # + rel bias

    # softmax over sectors R (f32; EUP reciprocal)
    mmax = jnp.max(logits, axis=1, keepdims=True)
    p = jnp.exp(logits - mmax)
    denom = jnp.sum(p, axis=1, keepdims=True)
    attn = (p * pl.reciprocal(denom, approx=True)).reshape(N * R, H)

    # head->channel expansion (MXU) and attn·V contraction over R (MXU).
    attn_e = jnp.dot(attn.astype(jnp.bfloat16), selT_ref[...],
                     preferred_element_type=jnp.float32)                      # (N*R, C)
    weighted = (attn_e * v).astype(jnp.bfloat16)
    ctx = jnp.dot(gsum_ref[...], weighted, preferred_element_type=jnp.float32)  # (N, C)

    out = jnp.dot(ctx.astype(jnp.bfloat16), wproj,
                  preferred_element_type=jnp.float32) + bproj
    y = out + y                                                               # residual

    # ---------------- PreNorm(FeedForward) + residual ----------------
    mu = jnp.mean(y, axis=-1, keepdims=True)
    var = jnp.mean((y - mu) ** 2, axis=-1, keepdims=True)
    xn = (y - mu) * jax.lax.rsqrt(var + eps)
    xn = xn * ln_g + ln_b                                                     # LayerNorm affine

    h1 = jnp.dot(xn.astype(jnp.bfloat16), w1, preferred_element_type=jnp.float32) + b1
    # tanh-approx GELU (EUP transcendental; within the 2e-2 budget vs exact erf)
    h1 = 0.5 * h1 * (1.0 + jnp.tanh(0.7978845608028654 *
                                    (h1 + 0.044715 * h1 * h1 * h1)))
    y2 = jnp.dot(h1.astype(jnp.bfloat16), w2_ref[...],
                 preferred_element_type=jnp.float32) + b2

    o_ref[...] = (y2 + y).astype(o_ref.dtype)                                 # residual


# ----------------------------------------------------------------------------- wrapper
def ds_msa_forward(x, assignment, mask_bool, params, heads):
    """x:(B,N,C), assignment:(N,N,R), mask_bool:(N,R) True==masked."""
    B, N, C = x.shape
    R = assignment.shape[-1]
    DEPTH = len(params)
    dh = C // heads
    scale = dh ** -0.5
    MLP = params[0]["w1"].shape[-1]
    W = 4 * C + MLP
    f32, bf16 = jnp.float32, jnp.bfloat16

    # ---- grid-invariant constants (stay VMEM-resident; no per-step DMA) ----
    # per-batch sector aggregation matrix (N*R, N)
    a2 = jnp.transpose(assignment, (0, 2, 1)).reshape(N * R, N).astype(bf16)
    # additive mask as a column: row n*R+r, broadcast over heads in-kernel
    mask_col = jnp.where(mask_bool, -1e30, 0.0).astype(f32).reshape(N * R, 1)
    # 0/1 head-selector (channel->head reduce) and its transpose (head->channel expand)
    sel_np = (np.arange(C)[:, None] // dh == np.arange(heads)[None, :]).astype(np.float32)
    sel = jnp.asarray(sel_np, dtype=bf16)                                  # (C, H)
    selT = jnp.asarray(sel_np.T, dtype=bf16)                               # (H, C)
    # sector-sum matrix: out[n, c] = sum_r weighted[n*R+r, c]
    gsum = jnp.asarray(np.kron(np.eye(N), np.ones((1, R))), dtype=bf16)    # (N, N*R)

    # ---- per-layer weights packed into a few stacked slabs ----
    stack = lambda key: jnp.stack([p[key] for p in params])
    w_slab = jnp.concatenate(
        [stack("wq"), stack("wk"), stack("wv"), stack("wproj"), stack("w1")],
        axis=-1).astype(bf16)                                              # (D, C, 4C+MLP)
    w2_slab = stack("w2").astype(bf16)                                     # (D, MLP, C)
    vec_slab = jnp.concatenate(
        [stack("bproj"), stack("ln_g"), stack("ln_b"), stack("b2"), stack("b1")],
        axis=-1).astype(f32)                                               # (D, 1, 4C+MLP)
    relb = jnp.stack([p["rel_bias"].T for p in params]).astype(f32)        # (D, R, H)

    def const_spec(shape):            # batch/depth-invariant constant
        return pl.BlockSpec(shape, lambda b, d, n=len(shape): (0,) * n)

    def per_depth(shape):             # per-layer stacked slab (leading depth dim squeezed)
        return pl.BlockSpec((None,) + shape,
                            lambda b, d, n=len(shape): (d,) + (0,) * n)

    kernel = functools.partial(_ds_msa_layer_kernel, N=N, C=C, H=heads, R=R,
                               MLP=MLP, scale=scale, eps=1e-5)

    out = pl.pallas_call(
        kernel,
        out_shape=jax.ShapeDtypeStruct((B, N, C), x.dtype),
        grid_spec=pltpu.PrefetchScalarGridSpec(
            num_scalar_prefetch=0,
            grid=(B, DEPTH),
            in_specs=[
                pl.BlockSpec((None, N, C), lambda b, d: (b, 0, 0)),   # x (read at d==0)
                const_spec((N * R, N)),                               # assignment agg
                const_spec((N * R, 1)),                               # additive mask
                const_spec((C, heads)),                               # head selector
                const_spec((heads, C)),                               # head expander
                const_spec((N, N * R)),                               # sector-sum matrix
                per_depth((C, W)),                                    # [wq|wk|wv|wproj|w1]
                per_depth((MLP, C)),                                  # w2
                per_depth((1, W)),                                    # [bproj|ln_g|ln_b|b2|b1]
                per_depth((R, heads)),                                # relative bias
            ],
            out_specs=pl.BlockSpec((None, N, C), lambda b, d: (b, 0, 0)),
        ),
        compiler_params=pltpu.CompilerParams(
            dimension_semantics=("parallel", "arbitrary"),   # batch across cores (v7x), depth serial
            vmem_limit_bytes=32 * 1024 * 1024),
    )(x, a2, mask_col, sel, selT, gsum, w_slab, w2_slab, vec_slab, relb)

    return out


# ----------------------------------------------------------------------------- pure-JAX reference
def ref_forward(x, assignment, mask_bool, params, heads):
    B, N, C = x.shape
    R = assignment.shape[-1]
    dh = C // heads
    scale = dh ** -0.5
    y = x
    for p in params:
        pre_kv = jnp.einsum("bnc,mnr->bmrc", y, assignment)            # (B,N,R,C)
        q = (y @ p["wq"]).reshape(B, N, heads, dh)
        k = (pre_kv @ p["wk"]).reshape(B, N, R, heads, dh)
        v = (pre_kv @ p["wv"]).reshape(B, N, R, heads, dh)
        logits = jnp.einsum("bnhd,bnrhd->bnhr", q, k) * scale
        logits = logits + p["rel_bias"][None, None]
        logits = jnp.where(mask_bool[None, :, None, :], -jnp.inf, logits)
        attn = jax.nn.softmax(logits, axis=-1)
        o = jnp.einsum("bnhr,bnrhd->bnhd", attn, v).reshape(B, N, C)
        o = o @ p["wproj"] + p["bproj"]
        y = o + y
        mu = jnp.mean(y, -1, keepdims=True)
        var = jnp.mean((y - mu) ** 2, -1, keepdims=True)
        xn = (y - mu) / jnp.sqrt(var + 1e-5) * p["ln_g"] + p["ln_b"]
        h = xn @ p["w1"] + p["b1"]
        h = 0.5 * h * (1.0 + jax.scipy.special.erf(h / jnp.sqrt(2.0)))
        y = (h @ p["w2"] + p["b2"]) + y
    return y


# ----------------------------------------------------------------------------- main
if __name__ == "__main__":
    B, N, C, H, R, MLP, DEPTH = 2, 8, 32, 4, 16, 64, 2

    key = jax.random.PRNGKey(0)
    keys = iter(jax.random.split(key, 128))

    def rnd(shape, s=0.1):
        return jax.random.normal(next(keys), shape, jnp.float32) * s

    x = rnd((B, N, C), 1.0)
    assignment = rnd((N, N, R), 0.2)                      # torch module's `assignment`
    mask_bool = jax.random.bernoulli(next(keys), 0.3, (N, R))
    mask_bool = mask_bool.at[:, 0].set(False)             # >=1 unmasked sector per node
    # NOTE: if a row were fully masked, the additive -1e30 softmax would return a
    # uniform distribution (the reference would produce NaN) — guarded by the data.

    params = []
    for _ in range(DEPTH):
        params.append(dict(
            wq=rnd((C, C)), wk=rnd((C, C)), wv=rnd((C, C)),
            rel_bias=rnd((H, R), 0.5),
            wproj=rnd((C, C)), bproj=rnd((1, C)),
            ln_g=1.0 + rnd((1, C), 0.05), ln_b=rnd((1, C), 0.05),
            w1=rnd((C, MLP)), b1=rnd((1, MLP)),
            w2=rnd((MLP, C)), b2=rnd((1, C)),
        ))

    fwd = jax.jit(lambda xx, asn, mm, ps: ds_msa_forward(xx, asn, mm, ps, heads=H))
    out = jax.block_until_ready(fwd(x, assignment, mask_bool, params))

    ref = jax.block_until_ready(ref_forward(x, assignment, mask_bool, params, H))
    max_err = float(jnp.max(jnp.abs(out - ref)))
    assert np.isfinite(max_err) and max_err < 2e-2, f"mismatch vs reference: {max_err}"

    # TODO(synk): dropout (p=0.0 here) is an identity; a nonzero-p training-mode
    # dropout would use pltpu.prng_seed/prng_random_bits inside the kernel.
    print("KERNEL_OK")
</pallas_src>

<mosaic_0001>
module attributes {stable_mosaic.version = 11 : i64} {
  func.func @_ds_msa_layer_kernel(%arg0: i32, %arg1: i32, %arg2: memref<1x8x32xf32, #tpu.memory_space<vmem>>, %arg3: memref<128x8xbf16, #tpu.memory_space<vmem>>, %arg4: memref<128x1xf32, #tpu.memory_space<vmem>>, %arg5: memref<32x4xbf16, #tpu.memory_space<vmem>>, %arg6: memref<4x32xbf16, #tpu.memory_space<vmem>>, %arg7: memref<8x128xbf16, #tpu.memory_space<vmem>>, %arg8: memref<1x32x192xbf16, #tpu.memory_space<vmem>>, %arg9: memref<1x64x32xbf16, #tpu.memory_space<vmem>>, %arg10: memref<1x1x192xf32, #tpu.memory_space<vmem>>, %arg11: memref<1x16x4xf32, #tpu.memory_space<vmem>>, %arg12: memref<1x8x32xf32, #tpu.memory_space<vmem>>) attributes {dimension_semantics = [#tpu.dimension_semantics<parallel>, #tpu.dimension_semantics<arbitrary>], iteration_bounds = array<i64: 2, 2>, scalar_prefetch = 0 : i64, scratch_operands = 0 : i64, tpu.core_type = #tpu.core_type<tc>, window_params = [{transform_indices = @transform_0, window_bounds = array<i64: 1, 8, 32>}, {pipeline_mode = #tpu.pipeline_mode<synchronous>, transform_indices = @transform_1, window_bounds = array<i64: 128, 8>}, {pipeline_mode = #tpu.pipeline_mode<synchronous>, transform_indices = @transform_2, window_bounds = array<i64: 128, 1>}, {pipeline_mode = #tpu.pipeline_mode<synchronous>, transform_indices = @transform_3, window_bounds = array<i64: 32, 4>}, {pipeline_mode = #tpu.pipeline_mode<synchronous>, transform_indices = @transform_4, window_bounds = array<i64: 4, 32>}, {pipeline_mode = #tpu.pipeline_mode<synchronous>, transform_indices = @transform_5, window_bounds = array<i64: 8, 128>}, {transform_indices = @transform_6, window_bounds = array<i64: 1, 32, 192>}, {transform_indices = @transform_7, window_bounds = array<i64: 1, 64, 32>}, {transform_indices = @transform_8, window_bounds = array<i64: 1, 1, 192>}, {transform_indices = @transform_9, window_bounds = array<i64: 1, 16, 4>}, {transform_indices = @transform_10, window_bounds = array<i64: 1, 8, 32>}]} {
    %c0_i32 = arith.constant 0 : i32
    %0 = arith.cmpi eq, %arg1, %c0_i32 : i32
    %1 = arith.extui %0 : i1 to i32
    %c0_i32_0 = arith.constant 0 : i32
    %2 = arith.cmpi ne, %1, %c0_i32_0 : i32
    scf.if %2 {
      %c0_69 = arith.constant 0 : index
      %c0_70 = arith.constant 0 : index
      %c0_71 = arith.constant 0 : index
      %123 = vector.load %arg2[%c0_69, %c0_70, %c0_71] : memref<1x8x32xf32, #tpu.memory_space<vmem>>, vector<1x8x32xf32>
      %124 = vector.shape_cast %123 : vector<1x8x32xf32> to vector<8x32xf32>
      %c0_72 = arith.constant 0 : index
      %c0_73 = arith.constant 0 : index
      %c0_74 = arith.constant 0 : index
      %125 = vector.load %arg12[%c0_72, %c0_73, %c0_74] : memref<1x8x32xf32, #tpu.memory_space<vmem>>, vector<1x8x32xf32>
      %126 = vector.shape_cast %125 : vector<1x8x32xf32> to vector<8x32xf32>
      %127 = vector.shape_cast %124 : vector<8x32xf32> to vector<1x8x32xf32>
      tpu.vector_store %arg12[%c0_72, %c0_73, %c0_74], %127 {strides = array<i32>} : memref<1x8x32xf32, #tpu.memory_space<vmem>>, vector<1x8x32xf32>,
    } else {
    }
    %c0 = arith.constant 0 : index
    %c0_1 = arith.constant 0 : index
    %c0_2 = arith.constant 0 : index
    %3 = vector.load %arg12[%c0, %c0_1, %c0_2] : memref<1x8x32xf32, #tpu.memory_space<vmem>>, vector<1x8x32xf32>
    %4 = vector.shape_cast %3 : vector<1x8x32xf32> to vector<8x32xf32>
    %5 = arith.truncf %4 : vector<8x32xf32> to vector<8x32xbf16>
    %c0_3 = arith.constant 0 : index
    %c0_4 = arith.constant 0 : index
    %c0_5 = arith.constant 0 : index
    %6 = vector.load %arg8[%c0_3, %c0_4, %c0_5] : memref<1x32x192xbf16, #tpu.memory_space<vmem>>, vector<1x32x32xbf16>
    %7 = vector.shape_cast %6 : vector<1x32x32xbf16> to vector<32x32xbf16>
    %c0_6 = arith.constant 0 : index
    %c0_7 = arith.constant 0 : index
    %c32 = arith.constant 32 : index
    %8 = vector.load %arg8[%c0_6, %c0_7, %c32] : memref<1x32x192xbf16, #tpu.memory_space<vmem>>, vector<1x32x32xbf16>
    %9 = vector.shape_cast %8 : vector<1x32x32xbf16> to vector<32x32xbf16>
    %c0_8 = arith.constant 0 : index
    %c0_9 = arith.constant 0 : index
    %c64 = arith.constant 64 : index
    %10 = vector.load %arg8[%c0_8, %c0_9, %c64] : memref<1x32x192xbf16, #tpu.memory_space<vmem>>, vector<1x32x32xbf16>
    %11 = vector.shape_cast %10 : vector<1x32x32xbf16> to vector<32x32xbf16>
    %c0_10 = arith.constant 0 : index
    %c0_11 = arith.constant 0 : index
    %c96 = arith.constant 96 : index
    %12 = vector.load %arg8[%c0_10, %c0_11, %c96] : memref<1x32x192xbf16, #tpu.memory_space<vmem>>, vector<1x32x32xbf16>
    %13 = vector.shape_cast %12 : vector<1x32x32xbf16> to vector<32x32xbf16>
    %c0_12 = arith.constant 0 : index
    %c0_13 = arith.constant 0 : index
    %c128 = arith.constant 128 : index
    %14 = vector.load %arg8[%c0_12, %c0_13, %c128] : memref<1x32x192xbf16, #tpu.memory_space<vmem>>, vector<1x32x64xbf16>
    %15 = vector.shape_cast %14 : vector<1x32x64xbf16> to vector<32x64xbf16>
    %c0_14 = arith.constant 0 : index
    %c0_15 = arith.constant 0 : index
    %c0_16 = arith.constant 0 : index
    %16 = vector.load %arg10[%c0_14, %c0_15, %c0_16] : memref<1x1x192xf32, #tpu.memory_space<vmem>>, vector<1x1x32xf32>
    %17 = vector.shape_cast %16 : vector<1x1x32xf32> to vector<1x32xf32>
    %c0_17 = arith.constant 0 : index
    %c0_18 = arith.constant 0 : index
    %c32_19 = arith.constant 32 : index
    %18 = vector.load %arg10[%c0_17, %c0_18, %c32_19] : memref<1x1x192xf32, #tpu.memory_space<vmem>>, vector<1x1x32xf32>
    %19 = vector.shape_cast %18 : vector<1x1x32xf32> to vector<1x32xf32>
    %c0_20 = arith.constant 0 : index
    %c0_21 = arith.constant 0 : index
    %c64_22 = arith.constant 64 : index
    %20 = vector.load %arg10[%c0_20, %c0_21, %c64_22] : memref<1x1x192xf32, #tpu.memory_space<vmem>>, vector<1x1x32xf32>
    %21 = vector.shape_cast %20 : vector<1x1x32xf32> to vector<1x32xf32>
    %c0_23 = arith.constant 0 : index
    %c0_24 = arith.constant 0 : index
    %c96_25 = arith.constant 96 : index
    %22 = vector.load %arg10[%c0_23, %c0_24, %c96_25] : memref<1x1x192xf32, #tpu.memory_space<vmem>>, vector<1x1x32xf32>
    %23 = vector.shape_cast %22 : vector<1x1x32xf32> to vector<1x32xf32>
    %c0_26 = arith.constant 0 : index
    %c0_27 = arith.constant 0 : index
    %c128_28 = arith.constant 128 : index
    %24 = vector.load %arg10[%c0_26, %c0_27, %c128_28] : memref<1x1x192xf32, #tpu.memory_space<vmem>>, vector<1x1x64xf32>
    %25 = vector.shape_cast %24 : vector<1x1x64xf32> to vector<1x64xf32>
    %c0_29 = arith.constant 0 : index
    %c0_30 = arith.constant 0 : index
    %26 = vector.load %arg3[%c0_29, %c0_30] : memref<128x8xbf16, #tpu.memory_space<vmem>>, vector<128x8xbf16>
    %cst = arith.constant dense<0.000000e+00> : vector<128x32xf32>
    %27 = tpu.matmul %26, %5, %cst {dimension_numbers = #tpu.dot_dimension_numbers<[1], [0], [0], [1], [0, 0, 1, 1], [], []>} : vector<128x8xbf16>, vector<8x32xbf16>, vector<128x32xf32> -> vector<128x32xf32>
    %28 = arith.truncf %27 : vector<128x32xf32> to vector<128x32xbf16>
    %cst_31 = arith.constant dense<0.000000e+00> : vector<8x32xf32>
    %29 = tpu.matmul %5, %7, %cst_31 {dimension_numbers = #tpu.dot_dimension_numbers<[1], [0], [0], [1], [0, 0, 1, 1], [], []>} : vector<8x32xbf16>, vector<32x32xbf16>, vector<8x32xf32> -> vector<8x32xf32>
    %cst_32 = arith.constant dense<0.000000e+00> : vector<128x32xf32>
    %30 = tpu.matmul %28, %9, %cst_32 {dimension_numbers = #tpu.dot_dimension_numbers<[1], [0], [0], [1], [0, 0, 1, 1], [], []>} : vector<128x32xbf16>, vector<32x32xbf16>, vector<128x32xf32> -> vector<128x32xf32>
    %cst_33 = arith.constant dense<0.000000e+00> : vector<128x32xf32>
    %31 = tpu.matmul %28, %11, %cst_33 {dimension_numbers = #tpu.dot_dimension_numbers<[1], [0], [0], [1], [0, 0, 1, 1], [], []>} : vector<128x32xbf16>, vector<32x32xbf16>, vector<128x32xf32> -> vector<128x32xf32>
    %32 = vector.shape_cast %30 : vector<128x32xf32> to vector<8x16x32xf32>
    %33 = vector.shape_cast %29 : vector<8x32xf32> to vector<8x1x32xf32>
    %34 = vector.broadcast %33 : vector<8x1x32xf32> to vector<8x16x32xf32>
    %35 = arith.mulf %32, %34 : vector<8x16x32xf32>
    %36 = vector.shape_cast %35 : vector<8x16x32xf32> to vector<128x32xf32>
    %37 = arith.truncf %36 : vector<128x32xf32> to vector<128x32xbf16>
    %c0_34 = arith.constant 0 : index
    %c0_35 = arith.constant 0 : index
    %38 = vector.load %arg5[%c0_34, %c0_35] : memref<32x4xbf16, #tpu.memory_space<vmem>>, vector<32x4xbf16>
    %cst_36 = arith.constant dense<0.000000e+00> : vector<128x4xf32>
    %39 = tpu.matmul %37, %38, %cst_36 {dimension_numbers = #tpu.dot_dimension_numbers<[1], [0], [0], [1], [0, 0, 1, 1], [], []>} : vector<128x32xbf16>, vector<32x4xbf16>, vector<128x4xf32> -> vector<128x4xf32>
    %cst_37 = arith.constant 0.353553385 : f32
    %40 = vector.broadcast %cst_37 : f32 to vector<128x4xf32>
    %41 = arith.mulf %39, %40 : vector<128x4xf32>
    %c0_38 = arith.constant 0 : index
    %c0_39 = arith.constant 0 : index
    %42 = vector.load %arg4[%c0_38, %c0_39] : memref<128x1xf32, #tpu.memory_space<vmem>>, vector<128x1xf32>
    %43 = vector.broadcast %42 : vector<128x1xf32> to vector<128x4xf32>
    %44 = arith.addf %41, %43 : vector<128x4xf32>
    %45 = vector.shape_cast %44 : vector<128x4xf32> to vector<8x16x4xf32>
    %c0_40 = arith.constant 0 : index
    %c0_41 = arith.constant 0 : index
    %c0_42 = arith.constant 0 : index
    %46 = vector.load %arg11[%c0_40, %c0_41, %c0_42] : memref<1x16x4xf32, #tpu.memory_space<vmem>>, vector<1x16x4xf32>
    %47 = vector.shape_cast %46 : vector<1x16x4xf32> to vector<16x4xf32>
    %48 = vector.shape_cast %47 : vector<16x4xf32> to vector<1x16x4xf32>
    %49 = vector.broadcast %48 : vector<1x16x4xf32> to vector<8x16x4xf32>
    %50 = arith.addf %45, %49 : vector<8x16x4xf32>
    %cst_43 = arith.constant dense<0xFF800000> : vector<8x4xf32>
    %51 = vector.multi_reduction <maximumf>, %50, %cst_43 [1] : vector<8x16x4xf32> to vector<8x4xf32>
    %52 = vector.shape_cast %51 : vector<8x4xf32> to vector<8x1x4xf32>
    %53 = vector.broadcast %52 : vector<8x1x4xf32> to vector<8x16x4xf32>
    %54 = arith.subf %50, %53 : vector<8x16x4xf32>
    %55 = math.exp %54 : vector<8x16x4xf32>
    %cst_44 = arith.constant dense<0.000000e+00> : vector<8x4xf32>
    %56 = vector.multi_reduction <add>, %55, %cst_44 [1] : vector<8x16x4xf32> to vector<8x4xf32>
    %57 = vector.shape_cast %56 : vector<8x4xf32> to vector<8x1x4xf32>
    %58 = tpu.reciprocal %57 {approx = true} : vector<8x1x4xf32> -> vector<8x1x4xf32>
    %59 = vector.broadcast %58 : vector<8x1x4xf32> to vector<8x16x4xf32>
    %60 = arith.mulf %55, %59 : vector<8x16x4xf32>
    %61 = vector.shape_cast %60 : vector<8x16x4xf32> to vector<128x4xf32>
    %62 = arith.truncf %61 : vector<128x4xf32> to vector<128x4xbf16>
    %c0_45 = arith.constant 0 : index
    %c0_46 = arith.constant 0 : index
    %63 = vector.load %arg6[%c0_45, %c0_46] : memref<4x32xbf16, #tpu.memory_space<vmem>>, vector<4x32xbf16>
    %cst_47 = arith.constant dense<0.000000e+00> : vector<128x32xf32>
    %64 = tpu.matmul %62, %63, %cst_47 {dimension_numbers = #tpu.dot_dimension_numbers<[1], [0], [0], [1], [0, 0, 1, 1], [], []>} : vector<128x4xbf16>, vector<4x32xbf16>, vector<128x32xf32> -> vector<128x32xf32>
    %65 = arith.mulf %64, %31 : vector<128x32xf32>
    %66 = arith.truncf %65 : vector<128x32xf32> to vector<128x32xbf16>
    %c0_48 = arith.constant 0 : index
    %c0_49 = arith.constant 0 : index
    %67 = vector.load %arg7[%c0_48, %c0_49] : memref<8x128xbf16, #tpu.memory_space<vmem>>, vector<8x128xbf16>
    %cst_50 = arith.constant dense<0.000000e+00> : vector<8x32xf32>
    %68 = tpu.matmul %67, %66, %cst_50 {dimension_numbers = #tpu.dot_dimension_numbers<[1], [0], [0], [1], [0, 0, 1, 1], [], []>} : vector<8x128xbf16>, vector<128x32xbf16>, vector<8x32xf32> -> vector<8x32xf32>
    %69 = arith.truncf %68 : vector<8x32xf32> to vector<8x32xbf16>
    %cst_51 = arith.constant dense<0.000000e+00> : vector<8x32xf32>
    %70 = tpu.matmul %69, %13, %cst_51 {dimension_numbers = #tpu.dot_dimension_numbers<[1], [0], [0], [1], [0, 0, 1, 1], [], []>} : vector<8x32xbf16>, vector<32x32xbf16>, vector<8x32xf32> -> vector<8x32xf32>
    %71 = vector.broadcast %17 : vector<1x32xf32> to vector<8x32xf32>
    %72 = arith.addf %70, %71 : vector<8x32xf32>
    %73 = arith.addf %72, %4 : vector<8x32xf32>
    %cst_52 = arith.constant dense<0.000000e+00> : vector<8xf32>
    %74 = vector.multi_reduction <add>, %73, %cst_52 [1] : vector<8x32xf32> to vector<8xf32>
    %75 = vector.shape_cast %74 : vector<8xf32> to vector<8x1xf32>
    %cst_53 = arith.constant 3.200000e+01 : f32
    %76 = vector.broadcast %cst_53 : f32 to vector<8x1xf32>
    %77 = arith.divf %75, %76 : vector<8x1xf32>
    %78 = vector.broadcast %77 : vector<8x1xf32> to vector<8x32xf32>
    %79 = arith.subf %73, %78 : vector<8x32xf32>
    %80 = arith.mulf %79, %79 : vector<8x32xf32>
    %cst_54 = arith.constant dense<0.000000e+00> : vector<8xf32>
    %81 = vector.multi_reduction <add>, %80, %cst_54 [1] : vector<8x32xf32> to vector<8xf32>
    %82 = vector.shape_cast %81 : vector<8xf32> to vector<8x1xf32>
    %cst_55 = arith.constant 3.200000e+01 : f32
    %83 = vector.broadcast %cst_55 : f32 to vector<8x1xf32>
    %84 = arith.divf %82, %83 : vector<8x1xf32>
    %85 = vector.broadcast %77 : vector<8x1xf32> to vector<8x32xf32>
    %86 = arith.subf %73, %85 : vector<8x32xf32>
    %cst_56 = arith.constant 9.99999974E-6 : f32
    %87 = vector.broadcast %cst_56 : f32 to vector<8x1xf32>
    %88 = arith.addf %84, %87 : vector<8x1xf32>
    %89 = math.rsqrt %88 : vector<8x1xf32>
    %90 = vector.broadcast %89 : vector<8x1xf32> to vector<8x32xf32>
    %91 = arith.mulf %86, %90 : vector<8x32xf32>
    %92 = vector.broadcast %19 : vector<1x32xf32> to vector<8x32xf32>
    %93 = arith.mulf %91, %92 : vector<8x32xf32>
    %94 = vector.broadcast %21 : vector<1x32xf32> to vector<8x32xf32>
    %95 = arith.addf %93, %94 : vector<8x32xf32>
    %96 = arith.truncf %95 : vector<8x32xf32> to vector<8x32xbf16>
    %cst_57 = arith.constant dense<0.000000e+00> : vector<8x64xf32>
    %97 = tpu.matmul %96, %15, %cst_57 {dimension_numbers = #tpu.dot_dimension_numbers<[1], [0], [0], [1], [0, 0, 1, 1], [], []>} : vector<8x32xbf16>, vector<32x64xbf16>, vector<8x64xf32> -> vector<8x64xf32>
    %98 = vector.broadcast %25 : vector<1x64xf32> to vector<8x64xf32>
    %99 = arith.addf %97, %98 : vector<8x64xf32>
    %cst_58 = arith.constant 5.000000e-01 : f32
    %100 = vector.broadcast %cst_58 : f32 to vector<8x64xf32>
    %101 = arith.mulf %100, %99 : vector<8x64xf32>
    %cst_59 = arith.constant 4.471500e-02 : f32
    %102 = vector.broadcast %cst_59 : f32 to vector<8x64xf32>
    %103 = arith.mulf %102, %99 : vector<8x64xf32>
    %104 = arith.mulf %103, %99 : vector<8x64xf32>
    %105 = arith.mulf %104, %99 : vector<8x64xf32>
    %106 = arith.addf %99, %105 : vector<8x64xf32>
    %cst_60 = arith.constant 0.797884583 : f32
    %107 = vector.broadcast %cst_60 : f32 to vector<8x64xf32>
    %108 = arith.mulf %107, %106 : vector<8x64xf32>
    %109 = math.tanh %108 : vector<8x64xf32>
    %cst_61 = arith.constant 1.000000e+00 : f32
    %110 = vector.broadcast %cst_61 : f32 to vector<8x64xf32>
    %111 = arith.addf %110, %109 : vector<8x64xf32>
    %112 = arith.mulf %101, %111 : vector<8x64xf32>
    %113 = arith.truncf %112 : vector<8x64xf32> to vector<8x64xbf16>
    %c0_62 = arith.constant 0 : index
    %c0_63 = arith.constant 0 : index
    %c0_64 = arith.constant 0 : index
    %114 = vector.load %arg9[%c0_62, %c0_63, %c0_64] : memref<1x64x32xbf16, #tpu.memory_space<vmem>>, vector<1x64x32xbf16>
    %115 = vector.shape_cast %114 : vector<1x64x32xbf16> to vector<64x32xbf16>
    %cst_65 = arith.constant dense<0.000000e+00> : vector<8x32xf32>
    %116 = tpu.matmul %113, %115, %cst_65 {dimension_numbers = #tpu.dot_dimension_numbers<[1], [0], [0], [1], [0, 0, 1, 1], [], []>} : vector<8x64xbf16>, vector<64x32xbf16>, vector<8x32xf32> -> vector<8x32xf32>
    %117 = vector.broadcast %23 : vector<1x32xf32> to vector<8x32xf32>
    %118 = arith.addf %116, %117 : vector<8x32xf32>
    %119 = arith.addf %118, %73 : vector<8x32xf32>
    %c0_66 = arith.constant 0 : index
    %c0_67 = arith.constant 0 : index
    %c0_68 = arith.constant 0 : index
    %120 = vector.load %arg12[%c0_66, %c0_67, %c0_68] : memref<1x8x32xf32, #tpu.memory_space<vmem>>, vector<1x8x32xf32>
    %121 = vector.shape_cast %120 : vector<1x8x32xf32> to vector<8x32xf32>
    %122 = vector.shape_cast %119 : vector<8x32xf32> to vector<1x8x32xf32>
    tpu.vector_store %arg12[%c0_66, %c0_67, %c0_68], %122 {strides = array<i32>} : memref<1x8x32xf32, #tpu.memory_space<vmem>>, vector<1x8x32xf32>,
    return
  }
  func.func @transform_0(%arg0: i32, %arg1: i32) -> (i32, i32, i32) {
    %c0_i32 = arith.constant 0 : i32
    %c0_i32_0 = arith.constant 0 : i32
    %c0_i32_1 = arith.constant 0 : i32
    return %arg0, %c0_i32, %c0_i32_0 : i32, i32, i32
  }
  func.func @transform_1(%arg0: i32, %arg1: i32) -> (i32, i32) {
    %c0_i32 = arith.constant 0 : i32
    %c0_i32_0 = arith.constant 0 : i32
    %c0_i32_1 = arith.constant 0 : i32
    return %c0_i32, %c0_i32_0 : i32, i32
  }
  func.func @transform_2(%arg0: i32, %arg1: i32) -> (i32, i32) {
    %c0_i32 = arith.constant 0 : i32
    %c0_i32_0 = arith.constant 0 : i32
    %c0_i32_1 = arith.constant 0 : i32
    return %c0_i32, %c0_i32_0 : i32, i32
  }
  func.func @transform_3(%arg0: i32, %arg1: i32) -> (i32, i32) {
    %c0_i32 = arith.constant 0 : i32
    %c0_i32_0 = arith.constant 0 : i32
    %c0_i32_1 = arith.constant 0 : i32
    return %c0_i32, %c0_i32_0 : i32, i32
  }
  func.func @transform_4(%arg0: i32, %arg1: i32) -> (i32, i32) {
    %c0_i32 = arith.constant 0 : i32
    %c0_i32_0 = arith.constant 0 : i32
    %c0_i32_1 = arith.constant 0 : i32
    return %c0_i32, %c0_i32_0 : i32, i32
  }
  func.func @transform_5(%arg0: i32, %arg1: i32) -> (i32, i32) {
    %c0_i32 = arith.constant 0 : i32
    %c0_i32_0 = arith.constant 0 : i32
    %c0_i32_1 = arith.constant 0 : i32
    return %c0_i32, %c0_i32_0 : i32, i32
  }
  func.func @transform_6(%arg0: i32, %arg1: i32) -> (i32, i32, i32) {
    %c0_i32 = arith.constant 0 : i32
    %c0_i32_0 = arith.constant 0 : i32
    %c0_i32_1 = arith.constant 0 : i32
    return %arg1, %c0_i32, %c0_i32_0 : i32, i32, i32
  }
  func.func @transform_7(%arg0: i32, %arg1: i32) -> (i32, i32, i32) {
    %c0_i32 = arith.constant 0 : i32
    %c0_i32_0 = arith.constant 0 : i32
    %c0_i32_1 = arith.constant 0 : i32
    return %arg1, %c0_i32, %c0_i32_0 : i32, i32, i32
  }
  func.func @transform_8(%arg0: i32, %arg1: i32) -> (i32, i32, i32) {
    %c0_i32 = arith.constant 0 : i32
    %c0_i32_0 = arith.constant 0 : i32
    %c0_i32_1 = arith.constant 0 : i32
    return %arg1, %c0_i32, %c0_i32_0 : i32, i32, i32
  }
  func.func @transform_9(%arg0: i32, %arg1: i32) -> (i32, i32, i32) {
    %c0_i32 = arith.constant 0 : i32
    %c0_i32_0 = arith.constant 0 : i32
    %c0_i32_1 = arith.constant 0 : i32
    return %arg1, %c0_i32, %c0_i32_0 : i32, i32, i32
  }
  func.func @transform_10(%arg0: i32, %arg1: i32) -> (i32, i32, i32) {
    %c0_i32 = arith.constant 0 : i32
    %c0_i32_0 = arith.constant 0 : i32
    %c0_i32_1 = arith.constant 0 : i32
    return %arg0, %c0_i32, %c0_i32_0 : i32, i32, i32
  }
}

</mosaic_0001>

<bundles_post_ra>
// kernel: _lambda_.1
= control target key start
LH: loop header
LB: loop body
LE: loop exit
PB: predicated region body
PF: predicated region fallthrough
CT: control target
= control target key end

     0   :  { %s3310_s0 = inlined_call_operand.vmem [shape: f32[2,8,32], index: 0, kind: input, shape index: {}]   ;;  %s3311_s1 = inlined_call_operand.vmem [shape: bf16[128,8], index: 1, kind: input, shape index: {}]   ;;  %s3312_s2 = inlined_call_operand.vmem [shape: f32[128,1], index: 2, kind: input, shape index: {}]   ;;  %s3313_s3 = inlined_call_operand.vmem [shape: bf16[32,4], index: 3, kind: input, shape index: {}]   ;;  %s3314_s4 = inlined_call_operand.vmem [shape: bf16[4,32], index: 4, kind: input, shape index: {}]   ;;  %s3315_s5 = inlined_call_operand.vmem [shape: bf16[8,128], index: 5, kind: input, shape index: {}]   ;;  %s3316_s6 = inlined_call_operand.vmem [shape: bf16[2,32,192], index: 6, kind: input, shape index: {}]   ;;  %s3317_s7 = inlined_call_operand.vmem [shape: bf16[2,64,32], index: 7, kind: input, shape index: {}]   ;;  %s3318_s8 = inlined_call_operand.vmem [shape: f32[2,1,192], index: 8, kind: input, shape index: {}]   ;;  %s3319_s9 = inlined_call_operand.vmem [shape: f32[2,16,4], index: 9, kind: input, shape index: {}]   ;;  %s3320_s10 = inlined_call_operand.hbm [shape: f32[2,8,32], index: 10, kind: output, shape index: {}]  }
   0x1   :  { %3333 = sst [smem:[#allocation15_spill]] %s3320_s10 }
   0x2   :  { %15 = vsyncpa [#allocation3], 0 }
   0x3   :  { %17 = vsyncpa [#allocation3 + $0x1], 0  ;;  %s2737_s13 = smov 0   ;;  %s2739_s14 = smov 0  }
   0x4   :  { %s2741_s15 = smov 0   ;;  %s2743_s16 = smov 0  }
   0x5   :  { %s2745_s17 = smov 0   ;;  %s2747_s18 = smov 0  }
   0x6   :  { %s2749_s19 = smov 0   ;;  %s2751_s20 = smov 0  }
   0x7 LB: > { %3334 = sst [smem:[#allocation5_spill]] %s2644_s13  ;;  %s2116_s21 = sadd.s32 4294967295, %s2672_s20   ;;  %s2672_s20 = sphi %s2751_s20, %s23_s20   ;;  %s2668_s19 = sphi %s2749_s19, %s3357_s19   ;;  %s2664_s18 = sphi %s2747_s18, %s3356_s18   ;;  %s2660_s17 = sphi %s2745_s17, %s3355_s17   ;;  %s2656_s16 = sphi %s2743_s16, %s3354_s16   ;;  %s2652_s15 = sphi %s2741_s15, %s3353_s15   ;;  %s2648_s14 = sphi %s2739_s14, %s3359_s14   ;;  %s2644_s13 = sphi %s2737_s13, %s3358_s13  }
   0x8   : > { %3335 = sst [smem:[#allocation6_spill]] %s2652_s15  ;;  %s2117_s22 = sadd.s32 4294967294, %s2672_s20  }
   0x9   : > { %3336 = sst [smem:[#allocation7_spill]] %s2664_s18  ;;  %s32_s23 = sadd.s32 1, %s2664_s18 }
   0xa   : > { %3337 = sst [smem:[#allocation8_spill]] %s2668_s19  ;;  %p33_p0 = scmp.ge.s32.totalorder %s32_s23, 2 }
   0xb   : > { %3338 = sst [smem:[#allocation9_spill]] %s2672_s20  ;;  %s35_s24 = sadd.s32 1, %s2668_s19 }
   0xc   : > { %p287_p1 = scmp.ne.s32.totalorder %s2652_s15, %s2648_s14  ;;  %p288_p2 = scmp.eq.s32.totalorder %s2116_s21, 3 }
   0xd   : > { %s3361_s23 = smov (%p33_p0, %s32_s23), 0  ;;  %s3363_s24 = smov (!%p33_p0, %s35_s24), %s2668_s19 }
   0xe   : > { %3339 = sst [smem:[#allocation10_spill]] %s3361_s23  ;;  %p2786_p3 = por %p288_p2, %p287_p1 }
   0xf   : > { %p293_p4 = scmp.ne.s32.totalorder %s2648_s14, %s2644_s13  ;;  %p37_p5 = scmp.ge.s32.totalorder %s3363_s24, 2 }
  0x10   : > { %s3340_s25 = scalar_select %p2786_p3, 1, 0 }
  0x11   : > { %p294_p6 = scmp.eq.s32.totalorder %s2117_s22, 3  ;;  %p2120_p7 = scmp.ge.s32.totalorder %s2672_s20, 1 }
  0x12   : > { %3341 = sst [smem:[#allocation11_spill]] %s3340_s25  ;;  %p365_p8 = scmp.lt.s32.totalorder %s2672_s20, 5 }
  0x13   : > { %s3365_s24 = smov (%p37_p5, %s3363_s24), 0  ;;  %p2796_p9 = por %p294_p6, %p293_p4 }
  0x14   : > { %3342 = sst [smem:[#allocation12_spill]] %s3365_s24  ;;  %p366_p10 = pnand %p2120_p7, %p365_p8 }
  0x15   : > { %s3343_s26 = scalar_select %p2796_p9, 1, 0 }
  0x16   : > { %s274_s27 = ssub.s32 %s2668_s19, %s3365_s24  ;;  %s277_s28 = sadd.s32 1, %s2652_s15 }
  0x17   : > { %3344 = sst [smem:[#allocation13_spill]] %s3343_s26  ;;  %p275_p11 = scmp.eq.s32.totalorder %s274_s27, 0 }
  0x18   : > { %369 = sbr.rel (%p366_p10) target bundleno = 2132 (0x854), region = 60  ;;  %s3327_s30 = sand.u32 (!%p366_p10), 1, %s2648_s14  }
  0x19   : > { %s2804_s29 = scalar_select %p275_p11, %s2652_s15, %s277_s28  }
  0x1a   : > { %p421_p12 = scmp.lt.s32.totalorder (!%p366_p10), %s2660_s17, 1  ;;  %s2121_s11 = sshll.u32 (!%p366_p10), %s3327_s30, 3 }
  0x1b   : > { %3345 = sst [smem:[#allocation14_spill]] %s2804_s29  ;;  %p425_p13 = scmp.lt.s32.totalorder (!%p366_p10), %s2656_s16, 1 }
  0x1c   : > { %s2836_s18 = scalar_lea.vmem (!%p366_p10), [#allocation2], %s2121_s11  ;;  %p2130_p0 = scmp.ne.s32.totalorder (!%p366_p10), %s2656_s16, 0 }
  0x1d   : > { %s422_s12 = scalar_select %p421_p12, %s2660_s17, 1 }
  0x1e   : > { %s426_s21 = scalar_select %p425_p13, %s2656_s16, 1 }
  0x1f   : > { %s2122_s22 = sshll.u32 %s422_s12, 3  ;;  %448 = sbr.rel (%p2130_p0) target bundleno = 38 (0x26), region = 64 }
  0x20   : > { %s424_s27 = scalar_lea.vmem %s3310_s0, %s2122_s22  ;;  %s2199_s28 = sshll.u32 %s426_s21, 5 }
  0x21   : > { %s2819_s29 = scalar_lea.vmem %s3316_s6, %s2199_s28  ;;  %s2824_s13 = scalar_lea.vmem %s3317_s7, %s2199_s28 }
  0x22   : > { %s2127_s30 = sshll.u32 %s426_s21, 1  ;;  %s2201_s20 = sshll.u32 %s426_s21, 4 }
  0x23   : > { %s2829_s12 = scalar_lea.vmem %s3318_s8, %s2127_s30  ;;  %s2834_s22 = scalar_lea.vmem %s3319_s9, %s2201_s20 }
  0x24   : > { %v449_v0 = vld [vmem:[%s424_s27] sm:$0xff]  ;;  %vm450_vm0 = vcmask 261120  }
  0x25   : > { %451 = vst.msk [vmem:[%s2836_s18] sm:$0xff] %vm450_vm0, %v449_v0 }
  0x26 PF: > { %vm545_vm1 = vcmask 1043456   ;;  %v2507_v3 = vld [vmem:[%s3311_s1] sm:$0xff]   ;;  %vm520_vm2 = vcmask 64512   ;;  %v2508_v5 = vld [vmem:[%s3311_s1 + $0x8] sm:$0xff]   ;;  %v2509_v6 = vld [vmem:[%s3311_s1 + $0x10] sm:$0xff]   ;;  %v2674_v7 = vmov 0  }
  0x27   : > { %2275 = vmatprep.mubr.msk.bf16.mxu0 %vm520_vm2, %v2507_v3  ;;  %2505 = vset.pattern.permute.xlu1 %v2674_v7  ;;  %v1206_v8 = vld [vmem:[%s3312_s2] sm:$0xff]  ;;  %v2515_v9 = vld [vmem:[%s2819_s29 + $0x10] ss:$8 sps:$4 sm:$0xff]   ;;  %v1207_v10 = vld [vmem:[%s3312_s2 + $0x8] sm:$0xff]  ;;  %s2675_s23 = smov 96   ;;  %v2676_v22 = vmov 0.0  }
  0x28   : > { %2506 = vset.pattern.permute.xlu0 %v2674_v7  ;;  %1224 = vperm.xlu1 %2505, %v1206_v8   ;;  %v2510_v11 = vld [vmem:[%s3311_s1 + $0x18] sm:$0xff]   ;;  %v2516_v12 = vld [vmem:[%s2819_s29] ss:$8 sps:$4 sm:$0xff]   ;;  %v1208_v15 = vld [vmem:[%s3312_s2 + $0x10] sm:$0xff]  ;;  %vm666_vm3 = vcmask 261120   ;;  %vm2677_vm4 = vmmov 0  }
  0x29   : > { %711 = vrot.lane.b32.xlu0 %v2515_v9, %s2675_s23  ;;  %v2511_v13 = vld [vmem:[%s3311_s1 + $0x20] sm:$0xff]   ;;  %v1209_v14 = vld [vmem:[%s3312_s2 + $0x18] sm:$0xff]  ;;  %v2512_v17 = vld [vmem:[%s3311_s1 + $0x28] sm:$0xff]   ;;  %2291 = vmatprep.subr.bf16.mxu1 %v2676_v22  ;;  %s2678_s21 = smov 64   ;;  %vm1586_vm5 = vcmask 1041408   ;;  %vm1336_vm6 = vcmask 31744  }
  0x2a   : > { %v1210_v16 = vld [vmem:[%s3312_s2 + $0x20] sm:$0xff]  ;;  %v2513_v18 = vld [vmem:[%s3311_s1 + $0x30] sm:$0xff]   ;;  %v1211_v19 = vld [vmem:[%s3312_s2 + $0x28] sm:$0xff]  ;;  %2292 = vmatpush3.bf16.msra.mxu1 %v2515_v9  ;;  %2295 = vmatprep.mubr.msk.bf16.mxu1 %vm2677_vm4, %v2676_v22  ;;  %vm1938_vm7 = vcmask 523264   ;;  %s3347_s26 = sld [smem:[#allocation15_spill]]  ;;  %s2681_s27 = smov [#allocation2]  }
  0x2b   : > { %v1212_v20 = vld [vmem:[%s3312_s2 + $0x30] sm:$0xff]  ;;  %v1213_v21 = vld [vmem:[%s3312_s2 + $0x38] sm:$0xff]  ;;  %v1214_v23 = vld [vmem:[%s3312_s2 + $0x40] sm:$0xff]  ;;  %2293 = vmatprep.subr.bf16.mxu1 %v2676_v22  ;;  %s2584_s28 = sshll.u32 %s2681_s27, 4  ;;  %s2585_s28 = int_to_ptr.vmem [resolvable:$false] %s2584_s28 }
  0x2c   : > { %v452_v1 = vld [vmem:[%s2836_s18] sm:$0xff]  ;;  %1229 = vperm.xlu1 %2505, %v1207_v10   ;;  %v2514_v24 = vld [vmem:[%s3311_s1 + $0x38] sm:$0xff]   ;;  %v1216_v26 = vld [vmem:[%s3312_s2 + $0x50] sm:$0xff]  ;;  %s2586_s24 = scalar_lea.vmem %s2585_s28, 256 }
  0x2d   : > { %v453_v2 = vpack.c.bf16 %v452_v1, %v452_v1  ;;  %709 = vrot.lane.b32.xlu0 %v2516_v12, %s2675_s23  ;;  %v1215_v25 = vld [vmem:[%s3312_s2 + $0x48] sm:$0xff]  ;;  %v1217_v27 = vld [vmem:[%s3312_s2 + $0x58] sm:$0xff]  ;;  %v1218_v28 = vld [vmem:[%s3312_s2 + $0x60] sm:$0xff] }
  0x2e   : > { %2294 = vmatpush3.bf16.msra.mxu1 %v2516_v12  ;;  %v1219_v29 = vld [vmem:[%s3312_s2 + $0x68] sm:$0xff]  ;;  %v1220_v30 = vld [vmem:[%s3312_s2 + $0x70] sm:$0xff]  ;;  %v1221_v31 = vld [vmem:[%s3312_s2 + $0x78] sm:$0xff] }
  0x2f   : > { %2425 = vmatprep.subr.msk.bf16.mxu0 %vm545_vm1, %v453_v2  ;;  %v547_v4 = vsel %vm545_vm1, %v453_v2, 0  ;;  %v2517_v33 = vld [vmem:[%s3313_s3 + $0x8] sm:$0xff]   ;;  %v2518_v60 = vld [vmem:[%s3313_s3] sm:$0xff]  }
  0x30   : > { %2274 = vmatpush3.bf16.msra.mxu0 %v547_v4  ;;  %1239 = vperm.xlu1 %2505, %v1209_v14  }
  0x31   : > { %1234 = vperm.xlu0 %2506, %v1208_v15   ;;  %2296 = vmatmul.mubr.msk.bf16.vlgmr.msra.gmra.mxu1 %vm666_vm3, %v453_v2 }
  0x33   : > { %2276 = vmatmul.mubr.msk.bf16.vlgmr.msra.gmra.mxu0 %vm520_vm2, %v2508_v5 }
  0x34   : > { %2279 = vmatprep.mubr.msk.bf16.mxu0 %vm520_vm2, %v2509_v6  ;;  %1244 = vperm.xlu1 %2505, %v1210_v16  }
  0x35   : > { %1249 = vperm.xlu0 %2506, %v1211_v19  }
  0x38   : > { %1254 = vperm.xlu1 %2505, %v1212_v20   ;;  %v944_v20 = vlaneseq }
  0x39   : > { %1259 = vperm.xlu0 %2506, %v1213_v21  }
  0x3b   : > { %2280 = vmatmul.mubr.msk.bf16.gmra.mxu0 %vm520_vm2, %v2510_v11 }
  0x3c   : > { %2283 = vmatprep.mubr.msk.bf16.mxu0 %vm520_vm2, %v2511_v13  ;;  %1264 = vperm.xlu1 %2505, %v1214_v23   ;;  %v945_v23 = vshrl.u32 %v944_v20, 7 }
  0x3d   : > { %1269 = vperm.xlu0 %2506, %v1215_v25  }
  0x40   : > { %1274 = vperm.xlu1 %2505, %v1216_v26  }
  0x41   : > { %1279 = vperm.xlu0 %2506, %v1217_v27  }
  0x43   : > { %2284 = vmatmul.mubr.msk.bf16.gmra.mxu0 %vm520_vm2, %v2512_v17 }
  0x44   : > { %2287 = vmatprep.mubr.msk.bf16.mxu0 %vm520_vm2, %v2513_v18  ;;  %1284 = vperm.xlu1 %2505, %v1218_v28   ;;  %v2679_v18 = vmov 1966171168  }
  0x45   : > { %1289 = vperm.xlu0 %2506, %v1219_v29   ;;  %v942_v19 = vunpack.c.l.s4 %v2679_v18 }
  0x47   : > { %v943_v21 = vunpack.c.0.s8 %v942_v19 }
  0x48   : > { %1294 = vperm.xlu1 %2505, %v1220_v30   ;;  %v991_v30 = vsub.s32 0, %v945_v23 }
  0x49   : > { %1299 = vperm.xlu0 %2506, %v1221_v31  }
  0x4b   : > { %2288 = vmatmul.mubr.msk.bf16.gmra.mxu0 %vm520_vm2, %v2514_v24  ;;  %v946_v24 = vsub.s32 %v943_v21, %v945_v23 }
  0x4c   : > { %838 = vrot.lane.b32.xlu1 %v2515_v9, %s2678_s21 }
  0x4d   : > { %836 = vrot.lane.b32.xlu0 %v2516_v12, %s2678_s21 }
  0x9b   : > { %v712_v32 = vpop.permute.xlu0 %711 }
  0x9c   : > { %2299 = vmatprep.subr.bf16.mxu1 %v712_v32 }
  0x9d   : > { %2300 = vmatpush3.bf16.msra.mxu1 %v712_v32 }
  0x9f   : > { %v710_v34 = vpop.permute.xlu0 %709 }
  0xa0   : > { %2301 = vmatprep.subr.bf16.mxu1 %v710_v34 }
  0xa1   : > { %2302 = vmatpush3.bf16.msra.mxu1 %v710_v34 }
  0xa2   : > { %2339 = vmatprep.subr.bf16.mxu1 %v2517_v33 }
  0xa3   : > { %v2935_v35 = vpop.permute.xlu1 %1224 }
  0xa7   : > { %v2937_v36 = vpop.permute.xlu1 %1229 }
  0xab   : > { %v2939_v37 = vpop.permute.xlu1 %1239 }
  0xac   : > { %v2941_v38 = vpop.permute.xlu0 %1234 }
  0xaf   : > { %v2943_v39 = vpop.permute.xlu1 %1244 }
  0xb0   : > { %v2945_v40 = vpop.permute.xlu0 %1249 }
  0xb3   : > { %v2947_v41 = vpop.permute.xlu1 %1254 }
  0xb4   : > { %v2949_v42 = vpop.permute.xlu0 %1259 }
  0xb7   : > { %v2951_v43 = vpop.permute.xlu1 %1264 }
  0xb8   : > { %v2953_v44 = vpop.permute.xlu0 %1269 }
  0xbb   : > { %v2955_v45 = vpop.permute.xlu1 %1274 }
  0xbc   : > { %v2957_v46 = vpop.permute.xlu0 %1279 }
  0xbf   : > { %v2959_v47 = vpop.permute.xlu1 %1284 }
  0xc0   : > { %v2961_v48 = vpop.permute.xlu0 %1289 }
  0xc3   : > { %v2963_v49 = vpop.permute.xlu1 %1294 }
  0xc4   : > { %v2965_v50 = vpop.permute.xlu0 %1299 }
  0xc7   : > { %v839_v51 = vpop.permute.xlu1 %838 }
  0xc8   : > { %2319 = vmatprep.subr.bf16.mxu0 %v839_v51  ;;  %v837_v52 = vpop.permute.xlu0 %836 }
  0xc9   : > { %2320 = vmatpush3.bf16.msra.mxu0 %v839_v51 }
  0xca   : > { %2321 = vmatprep.subr.bf16.mxu0 %v837_v52 }
  0xcd   : > { %2322 = vmatpush3.bf16.msra.mxu0 %v837_v52 }
  0xf1   : > { %v703_v10 = vpop.f32.mrf.mxu1 }
  0xf2   : > { %v947_v25 = vrot.slane %v703_v10, %v946_v24  ;;  %v940_v32 = vcombine.high %v703_v10, %v703_v10 }
  0xf3   : > { %v2277_v53 = vpop.f32.mrf.mxu0  ;;  %v2297_v12 = vpop.f32.mrf.mxu1 }
  0xf4   : > { %v955_v26 = vcombine.high %v947_v25, %v947_v25  ;;  %v963_v29 = vrot.slane %v947_v25, %v946_v24 }
  0xf5   : > { %v583_v54 = vpop.f32.mrf.mxu0  ;;  %v706_v15 = vpop.f32.mrf.mxu1 }
  0xf6   : > { %v977_v28 = vrot.slane %v955_v26, %v946_v24  ;;  %v992_v51 = vrot.slane %v963_v29, %v991_v30 }
  0xf7   : > { %v2278_v55 = vpop.f32.mrf.mxu0  ;;  %v2298_v17 = vpop.f32.mrf.mxu1 }
  0xf8   : > { %v647_v58 = vpack.c.bf16 %v2278_v55, %v2277_v53 }
  0xf9   : > { %v586_v56 = vpop.f32.mrf.mxu0 }
  0xfa   : > { %v646_v57 = vpack.c.bf16 %v586_v56, %v583_v54  ;;  %v954_v56 = vrot.slane %v940_v32, %v946_v24 }
  0xfb   : > { %v2281_v59 = vpop.f32.mrf.mxu0 }
  0xfc   : > { %2303 = vmatprep.mubr.msk.bf16.mxu1 %vm666_vm3, %v646_v57  ;;  %2323 = vmatprep.mubr.msk.bf16.mxu0 %vm666_vm3, %v646_v57  ;;  %v970_v12 = vrot.slane %v954_v56, %v946_v24 }
  0xfd   : > { %v599_v61 = vpop.f32.mrf.mxu0  ;;  %2304 = vmatmul.mubr.msk.bf16.vlgmr.msra.gmra.mxu1 %vm666_vm3, %v647_v58  ;;  %2324 = vmatmul.mubr.msk.bf16.vlgmr.msra.gmra.mxu0 %vm666_vm3, %v647_v58 }
  0xfe   : > { %2340 = vmatpush3.bf16.msra.mxu1 %v2517_v33  ;;  %v996_v33 = vrot.slane %v977_v28, %v991_v30  ;;  %v1008_v17 = vrot.slane %v970_v12, %v991_v30 }
  0xff   : > { %v2282_v62 = vpop.f32.mrf.mxu0  ;;  %2341 = vmatprep.subr.bf16.mxu1 %v2518_v60 }
 0x100   : > { %v649_v1 = vpack.c.bf16 %v2282_v62, %v2281_v59  ;;  %v987_v59 = vcombine.high %v977_v28, %v977_v28  ;;  %v986_v28 = vcombine.high %v970_v12, %v970_v12 }
 0x101   : > { %v602_v63 = vpop.f32.mrf.mxu0 }
 0x102   : > { %v648_v0 = vpack.c.bf16 %v602_v63, %v599_v61  ;;  %2342 = vmatpush3.bf16.msra.mxu1 %v2518_v60  ;;  %v985_v61 = vcombine.high %v963_v29, %v963_v29 }
 0x103   : > { %v2285_v2 = vpop.f32.mrf.mxu0  ;;  %2377 = vmatprep.subr.bf16.mxu1 %v2676_v22 }
 0x104   : > { %2307 = vmatprep.mubr.msk.bf16.mxu1 %vm666_vm3, %v648_v0  ;;  %2327 = vmatprep.mubr.msk.bf16.mxu0 %vm666_vm3, %v648_v0  ;;  %v956_v0 = vcombine.high %v954_v56, %v954_v56 }
 0x105   : > { %v615_v3 = vpop.f32.mrf.mxu0  ;;  %2308 = vmatmul.mubr.msk.bf16.gmra.mxu1 %vm666_vm3, %v649_v1  ;;  %2328 = vmatmul.mubr.msk.bf16.gmra.mxu0 %vm666_vm3, %v649_v1  ;;  %v1004_v1 = vrot.slane %v987_v59, %v991_v30 }
 0x106   : > { %v984_v10 = vrot.slane %v956_v0, %v946_v24 }
 0x107   : > { %v2286_v4 = vpop.f32.mrf.mxu0 }
 0x108   : > { %v651_v7 = vpack.c.bf16 %v2286_v4, %v2285_v2  ;;  %v1012_v15 = vrot.slane %v984_v10, %v991_v30  ;;  %v988_v26 = vcombine.high %v984_v10, %v984_v10 }
 0x109   : > { %v618_v5 = vpop.f32.mrf.mxu0 }
 0x10a   : > { %v650_v6 = vpack.c.bf16 %v618_v5, %v615_v3  ;;  %v1000_v3 = vrot.slane %v985_v61, %v991_v30 }
 0x10b   : > { %v2289_v8 = vpop.f32.mrf.mxu0 }
 0x10c   : > { %2311 = vmatprep.mubr.msk.bf16.mxu1 %vm666_vm3, %v650_v6  ;;  %2331 = vmatprep.mubr.msk.bf16.mxu0 %vm666_vm3, %v650_v6 }
 0x10d   : > { %v631_v9 = vpop.f32.mrf.mxu0  ;;  %2312 = vmatmul.mubr.msk.bf16.gmra.mxu1 %vm666_vm3, %v651_v7  ;;  %2332 = vmatmul.mubr.msk.bf16.gmra.mxu0 %vm666_vm3, %v651_v7 }
 0x10f   : > { %v2290_v11 = vpop.f32.mrf.mxu0 }
 0x110   : > { %v653_v16 = vpack.c.bf16 %v2290_v11, %v2289_v8 }
 0x111   : > { %v634_v13 = vpop.f32.mrf.mxu0 }
 0x112   : > { %v652_v14 = vpack.c.bf16 %v634_v13, %v631_v9 }
 0x114   : > { %2315 = vmatprep.mubr.msk.bf16.mxu1 %vm666_vm3, %v652_v14  ;;  %2335 = vmatprep.mubr.msk.bf16.mxu0 %vm666_vm3, %v652_v14 }
 0x115   : > { %2316 = vmatmul.mubr.msk.bf16.gmra.mxu1 %vm666_vm3, %v653_v16  ;;  %2336 = vmatmul.mubr.msk.bf16.gmra.mxu0 %vm666_vm3, %v653_v16 }
 0x1bd   : > { %v2305_v27 = vpop.f32.mrf.mxu1 }
 0x1be   : > { %v1031_v57 = vmul.f32 %v2305_v27, %v996_v33 }
 0x1bf   : > { %v773_v31 = vpop.f32.mrf.mxu1 }
 0x1c0   : > { %v1029_v54 = vmul.f32 %v992_v51, %v773_v31  ;;  %v1020_v31 = vrot.slane %v988_v26, %v991_v30 }
 0x1c1   : > { %v2306_v34 = vpop.f32.mrf.mxu1 }
 0x1c2   : > { %v1032_v52 = vmul.f32 %v2306_v34, %v996_v33  ;;  %v1016_v33 = vrot.slane %v986_v28, %v991_v30 }
 0x1c3   : > { %v776_v53 = vpop.f32.mrf.mxu1 }
 0x1c4   : > { %v1030_v55 = vmul.f32 %v992_v51, %v776_v53  ;;  %v1046_v62 = vpack.c.bf16 %v1032_v52, %v1031_v57  ;;  %v1561_v57 = vld [vmem:[%s3314_s4] sm:$0x3] }
 0x1c5   : > { %v2309_v58 = vpop.f32.mrf.mxu1  ;;  %2426 = vmatprep.subr.msk.bf16.mxu0 %vm1586_vm5, %v1561_v57  ;;  %v1588_v30 = vsel %vm1586_vm5, %v1561_v57, 0 }
 0x1c6   : > { %v1045_v60 = vpack.c.bf16 %v1030_v55, %v1029_v54  ;;  %v1035_v8 = vmul.f32 %v2309_v58, %v1004_v1  ;;  %2360 = vmatpush3.bf16.msra.mxu0 %v1588_v30 }
 0x1c7   : > { %v789_v63 = vpop.f32.mrf.mxu1  ;;  %2413 = vmatprep.subr.bf16.mxu0 %v2676_v22 }
 0x1c8   : > { %2343 = vmatprep.mubr.msk.bf16.mxu1 %vm666_vm3, %v1045_v60  ;;  %v1033_v6 = vmul.f32 %v1000_v3, %v789_v63 }
 0x1c9   : > { %v2310_v2 = vpop.f32.mrf.mxu1  ;;  %2344 = vmatmul.mubr.msk.bf16.vlgmr.msra.gmra.mxu1 %vm666_vm3, %v1046_v62  ;;  %v3003_v62 = vld [vmem:[%s2834_s22] sm:$0xff] }
 0x1ca   : > { %v1036_v4 = vmul.f32 %v2310_v2, %v1004_v1 }
 0x1cb   : > { %v792_v5 = vpop.f32.mrf.mxu1 }
 0x1cc   : > { %v1034_v7 = vmul.f32 %v1000_v3, %v792_v5  ;;  %v1048_v13 = vpack.c.bf16 %v1036_v4, %v1035_v8  ;;  %v3010_v4 = vld [vmem:[%s2834_s22 + $0x8] sm:$0xff]  ;;  %s2680_s22 = smov 32  }
 0x1cd   : > { %v2313_v9 = vpop.f32.mrf.mxu1 }
 0x1ce   : > { %v1047_v11 = vpack.c.bf16 %v1034_v7, %v1033_v6  ;;  %v1039_v23 = vmul.f32 %v2313_v9, %v1012_v15 }
 0x1cf   : > { %v805_v14 = vpop.f32.mrf.mxu1 }
 0x1d0   : > { %2347 = vmatprep.mubr.msk.bf16.mxu1 %vm666_vm3, %v1047_v11  ;;  %v1037_v20 = vmul.f32 %v1008_v17, %v805_v14 }
 0x1d1   : > { %v2314_v16 = vpop.f32.mrf.mxu1  ;;  %2348 = vmatmul.mubr.msk.bf16.gmra.mxu1 %vm666_vm3, %v1048_v13 }
 0x1d2   : > { %v1040_v18 = vmul.f32 %v2314_v16, %v1012_v15 }
 0x1d3   : > { %v808_v19 = vpop.f32.mrf.mxu1 }
 0x1d4   : > { %v1038_v21 = vmul.f32 %v1008_v17, %v808_v19  ;;  %v1050_v29 = vpack.c.bf16 %v1040_v18, %v1039_v23 }
 0x1d5   : > { %v2317_v25 = vpop.f32.mrf.mxu1 }
 0x1d6   : > { %v1049_v27 = vpack.c.bf16 %v1038_v21, %v1037_v20  ;;  %v1043_v54 = vmul.f32 %v2317_v25, %v1020_v31 }
 0x1d7   : > { %v821_v24 = vpop.f32.mrf.mxu1 }
 0x1d8   : > { %2351 = vmatprep.mubr.msk.bf16.mxu1 %vm666_vm3, %v1049_v27  ;;  %v1041_v52 = vmul.f32 %v1016_v33, %v821_v24 }
 0x1d9   : > { %v2318_v32 = vpop.f32.mrf.mxu1  ;;  %2352 = vmatmul.mubr.msk.bf16.gmra.mxu1 %vm666_vm3, %v1050_v29 }
 0x1da   : > { %v1044_v34 = vmul.f32 %v2318_v32, %v1020_v31 }
 0x1db   : > { %v824_v51 = vpop.f32.mrf.mxu1 }
 0x1dc   : > { %v1042_v53 = vmul.f32 %v1016_v33, %v824_v51  ;;  %v1052_v56 = vpack.c.bf16 %v1044_v34, %v1043_v54 }
 0x1de   : > { %v1051_v55 = vpack.c.bf16 %v1042_v53, %v1041_v52 }
 0x1e0   : > { %2355 = vmatprep.mubr.msk.bf16.mxu1 %vm666_vm3, %v1051_v55 }
 0x1e1   : > { %2356 = vmatmul.mubr.msk.bf16.gmra.mxu1 %vm666_vm3, %v1052_v56 }
 0x1e2   : > { %2393 = vmatprep.mubr.msk.bf16.mxu1 %vm2677_vm4, %v2676_v22 }
 0x289   : > { %v2345_v58 = vpop.f32.mrf.mxu1 }
 0x28a   : > { %v1192_v59 = vmul.f32 0.35355338, %v2345_v58 }
 0x28b   : > { %v1127_v60 = vpop.f32.mrf.mxu1 }
 0x28c   : > { %v1304_v61 = vadd.f32 %v2941_v38, %v1192_v59  ;;  %v1190_v63 = vmul.f32 0.35355338, %v1127_v60 }
 0x28d   : > { %v2346_v0 = vpop.f32.mrf.mxu1 }
 0x28e   : > { %v1302_v1 = vadd.f32 %v2935_v35, %v1190_v63  ;;  %v1193_v2 = vmul.f32 0.35355338, %v2346_v0  ;;  %v3007_v3 = vadd.f32 %v3003_v62, %v1304_v61 }
 0x28f   : > { %v1130_v5 = vpop.f32.mrf.mxu1 }
 0x290   : > { %v1305_v6 = vadd.f32 %v2939_v37, %v1193_v2  ;;  %v1191_v7 = vmul.f32 0.35355338, %v1130_v5  ;;  %v3014_v38 = vadd.f32 %v3003_v62, %v1302_v1  ;;  %v1346_v11 = vsel %vm1336_vm6, %v3007_v3, -inf }
 0x291   : > { %v2349_v8 = vpop.f32.mrf.mxu1 }
 0x292   : > { %v3017_v9 = vadd.f32 %v3010_v4, %v1305_v6  ;;  %v1303_v35 = vadd.f32 %v2937_v36, %v1191_v7  ;;  %v1196_v10 = vmul.f32 0.35355338, %v2349_v8  ;;  %v1337_v18 = vsel %vm1336_vm6, %v3014_v38, -inf }
 0x293   : > { %v1143_v12 = vpop.f32.mrf.mxu1 }
 0x294   : > { %v1347_v13 = vsel %vm1336_vm6, %v3017_v9, -inf  ;;  %v3025_v37 = vadd.f32 %v3010_v4, %v1303_v35  ;;  %v1308_v14 = vadd.f32 %v2947_v41, %v1196_v10  ;;  %v1194_v15 = vmul.f32 0.35355338, %v1143_v12 }
 0x295   : > { %v1348_v16 = vmax.f32 %v1346_v11, %v1347_v13  ;;  %v2350_v17 = vpop.f32.mrf.mxu1 }
 0x296   : > { %v1338_v36 = vsel %vm1336_vm6, %v3025_v37, -inf  ;;  %v1306_v19 = vadd.f32 %v2943_v39, %v1194_v15  ;;  %v1197_v20 = vmul.f32 0.35355338, %v2350_v17  ;;  %v3034_v25 = vadd.f32 %v3003_v62, %v1308_v14 }
 0x297   : > { %v1349_v21 = vrot.slane %v1348_v16, 4  ;;  %v1339_v23 = vmax.f32 %v1337_v18, %v1338_v36  ;;  %v1146_v26 = vpop.f32.mrf.mxu1 }
 0x298   : > { %v1309_v41 = vadd.f32 %v2949_v42, %v1197_v20  ;;  %v1195_v27 = vmul.f32 0.35355338, %v1146_v26  ;;  %v3038_v24 = vadd.f32 %v3003_v62, %v1306_v19  ;;  %v1364_v52 = vsel %vm1336_vm6, %v3034_v25, -inf }
 0x299   : > { %v1350_v28 = vmax.f32 %v1348_v16, %v1349_v21  ;;  %v1340_v29 = vrot.slane %v1339_v23, 4  ;;  %v2353_v31 = vpop.f32.mrf.mxu1 }
 0x29a   : > { %v3041_v32 = vadd.f32 %v3010_v4, %v1309_v41  ;;  %v1307_v39 = vadd.f32 %v2945_v40, %v1195_v27  ;;  %v1200_v33 = vmul.f32 0.35355338, %v2353_v31  ;;  %v1355_v40 = vsel %vm1336_vm6, %v3038_v24, -inf }
 0x29b   : > { %v1351_v34 = vrot.slane %v1350_v28, 2  ;;  %v1341_v51 = vmax.f32 %v1339_v23, %v1340_v29  ;;  %v1159_v53 = vpop.f32.mrf.mxu1 }
 0x29c   : > { %v1365_v42 = vsel %vm1336_vm6, %v3041_v32, -inf  ;;  %v3049_v54 = vadd.f32 %v3010_v4, %v1307_v39  ;;  %v1312_v55 = vadd.f32 %v2955_v45, %v1200_v33  ;;  %v1198_v56 = vmul.f32 0.35355338, %v1159_v53 }
 0x29d   : > { %v1352_v57 = vmax.f32 %v1350_v28, %v1351_v34  ;;  %v1342_v30 = vrot.slane %v1341_v51, 2  ;;  %v1366_v58 = vmax.f32 %v1364_v52, %v1365_v42  ;;  %v2354_v59 = vpop.f32.mrf.mxu1 }
 0x29e   : > { %v1356_v60 = vsel %vm1336_vm6, %v3049_v54, -inf  ;;  %v3057_v61 = vadd.f32 %v3003_v62, %v1312_v55  ;;  %v1310_v63 = vadd.f32 %v2951_v43, %v1198_v56  ;;  %v1201_v0 = vmul.f32 0.35355338, %v2354_v59 }
 0x29f   : > { %v1353_v1 = vrot.slane %v1352_v57, 1  ;;  %v1343_v2 = vmax.f32 %v1341_v51, %v1342_v30  ;;  %v1367_v45 = vrot.slane %v1366_v58, 4  ;;  %v1357_v5 = vmax.f32 %v1355_v40, %v1356_v60  ;;  %v1162_v6 = vpop.f32.mrf.mxu1 }
 0x2a0   : > { %v1382_v7 = vsel %vm1336_vm6, %v3057_v61, -inf  ;;  %v3063_v8 = vadd.f32 %v3003_v62, %v1310_v63  ;;  %v1313_v35 = vadd.f32 %v2957_v46, %v1201_v0  ;;  %v1199_v10 = vmul.f32 0.35355338, %v1162_v6 }
 0x2a1   : > { %v1354_v11 = vmax.f32 %v1352_v57, %v1353_v1  ;;  %v1344_v12 = vrot.slane %v1343_v2, 1  ;;  %v1368_v13 = vmax.f32 %v1366_v58, %v1367_v45  ;;  %v1358_v14 = vrot.slane %v1357_v5, 4  ;;  %v2357_v43 = vpop.f32.mrf.mxu1 }
 0x2a2   : > { %v1373_v15 = vsel %vm1336_vm6, %v3063_v8, -inf  ;;  %v3069_v16 = vadd.f32 %v3010_v4, %v1313_v35  ;;  %v1311_v17 = vadd.f32 %v2953_v44, %v1199_v10  ;;  %v1204_v18 = vmul.f32 0.35355338, %v2357_v43 }
 0x2a3   : > { %v1411_v36 = vsub.f32 %v3007_v3, %v1354_v11  ;;  %v1412_v19 = vsub.f32 %v3017_v9, %v1354_v11  ;;  %v1345_v46 = vmax.f32 %v1343_v2, %v1344_v12  ;;  %v1369_v20 = vrot.slane %v1368_v13, 2  ;;  %v1175_v21 = vpop.f32.mrf.mxu1 }
 0x2a4   : > { %v1359_v23 = vmax.f32 %v1357_v5, %v1358_v14  ;;  %v1383_v26 = vsel %vm1336_vm6, %v3069_v16, -inf  ;;  %v3077_v41 = vadd.f32 %v3010_v4, %v1311_v17  ;;  %v1316_v27 = vadd.f32 %v2963_v49, %v1204_v18 }
 0x2a5   : > { %v1429_v28 = vmul.f32 1.442695, %v1411_v36  ;;  %v1431_v29 = vmul.f32 1.442695, %v1412_v19  ;;  %v1409_v44 = vsub.f32 %v3014_v38, %v1345_v46  ;;  %v1410_v3 = vsub.f32 %v3025_v37, %v1345_v46  ;;  %v2358_v34 = vpop.f32.mrf.mxu1 }
 0x2a6   : > { %v1370_v31 = vmax.f32 %v1368_v13, %v1369_v20  ;;  %v1360_v9 = vrot.slane %v1359_v23, 2  ;;  %v1384_v39 = vmax.f32 %v1382_v7, %v1383_v26  ;;  %v1374_v33 = vsel %vm1336_vm6, %v3077_v41, -inf }
 0x2a7   : > { %2525 = vpow2.f32 %v1429_v28  ;;  %v1425_v51 = vmul.f32 1.442695, %v1409_v44  ;;  %v1427_v52 = vmul.f32 1.442695, %v1410_v3  ;;  %v1375_v53 = vmax.f32 %v1373_v15, %v1374_v33  ;;  %v1178_v58 = vpop.f32.mrf.mxu1 }
 0x2a8   : > { %2527 = vpow2.f32 %v1431_v29  ;;  %v1371_v42 = vrot.slane %v1370_v31, 1  ;;  %v1361_v49 = vmax.f32 %v1359_v23, %v1360_v9  ;;  %v1385_v55 = vrot.slane %v1384_v39, 4 }
 0x2a9   : > { %2529 = vpow2.f32 %v1425_v51  ;;  %v1376_v56 = vrot.slane %v1375_v53, 4  ;;  %v3085_v38 = vadd.f32 %v3003_v62, %v1316_v27  ;;  %v1202_v37 = vmul.f32 0.35355338, %v1175_v21 }
 0x2aa   : > { %2531 = vpow2.f32 %v1427_v52  ;;  %v1372_v57 = vmax.f32 %v1370_v31, %v1371_v42  ;;  %v1362_v30 = vrot.slane %v1361_v49, 1  ;;  %v1386_v40 = vmax.f32 %v1384_v39, %v1385_v55 }
 0x2ab   : > { %v1377_v59 = vmax.f32 %v1375_v53, %v1376_v56  ;;  %v1314_v60 = vadd.f32 %v2959_v47, %v1202_v37  ;;  %v1205_v63 = vmul.f32 0.35355338, %v2358_v34  ;;  %v1400_v6 = vsel %vm1336_vm6, %v3085_v38, -inf }
 0x2ac   : > { %v1415_v0 = vsub.f32 %v3034_v25, %v1372_v57  ;;  %v1416_v1 = vsub.f32 %v3041_v32, %v1372_v57  ;;  %v1363_v2 = vmax.f32 %v1361_v49, %v1362_v30  ;;  %v1387_v45 = vrot.slane %v1386_v40, 2 }
 0x2ad   : > { %v1378_v5 = vrot.slane %v1377_v59, 2  ;;  %v1317_v7 = vadd.f32 %v2965_v50, %v1205_v63  ;;  %v1203_v35 = vmul.f32 0.35355338, %v1178_v58  ;;  %v3096_v25 = vadd.f32 %v3003_v62, %v1314_v60 }
 0x2ae   : > { %v1437_v10 = vmul.f32 1.442695, %v1415_v0  ;;  %v1439_v11 = vmul.f32 1.442695, %v1416_v1  ;;  %v1413_v12 = vsub.f32 %v3038_v24, %v1363_v2  ;;  %v1414_v47 = vsub.f32 %v3049_v54, %v1363_v2 }
 0x2af   : > { %v1388_v13 = vmax.f32 %v1386_v40, %v1387_v45  ;;  %v1379_v14 = vmax.f32 %v1377_v59, %v1378_v5  ;;  %v3099_v32 = vadd.f32 %v3010_v4, %v1317_v7  ;;  %v1315_v50 = vadd.f32 %v2961_v48, %v1203_v35 }
 0x2b0   : > { %2533 = vpow2.f32 %v1437_v10  ;;  %v1433_v43 = vmul.f32 1.442695, %v1413_v12  ;;  %v1435_v15 = vmul.f32 1.442695, %v1414_v47  ;;  %v1391_v20 = vsel %vm1336_vm6, %v3096_v25, -inf }
 0x2b1   : > { %2535 = vpow2.f32 %v1439_v11  ;;  %v1389_v17 = vrot.slane %v1388_v13, 1  ;;  %v1380_v18 = vrot.slane %v1379_v14, 1  ;;  %v1401_v24 = vsel %vm1336_vm6, %v3099_v32, -inf }
 0x2b2   : > { %2537 = vpow2.f32 %v1433_v43  ;;  %v1402_v54 = vmax.f32 %v1400_v6, %v1401_v24  ;;  %v3105_v36 = vadd.f32 %v3010_v4, %v1315_v50 }
 0x2b3   : > { %2539 = vpow2.f32 %v1435_v15  ;;  %v1390_v62 = vmax.f32 %v1388_v13, %v1389_v17  ;;  %v1381_v19 = vmax.f32 %v1379_v14, %v1380_v18 }
 0x2b4   : > { %v3107_v46 = vpop.eup %2525  ;;  %v1403_v48 = vrot.slane %v1402_v54, 4  ;;  %v1392_v21 = vsel %vm1336_vm6, %v3105_v36, -inf }
 0x2b5   : > { %v3113_v23 = vpop.eup %2527  ;;  %v1466_v26 = vsel %vm1336_vm6, %v3107_v46, 0.0  ;;  %v1419_v4 = vsub.f32 %v3057_v61, %v1390_v62  ;;  %v1420_v27 = vsub.f32 %v3069_v16, %v1390_v62  ;;  %v1417_v28 = vsub.f32 %v3063_v8, %v1381_v19 }
 0x2b6   : > { %v3120_v29 = vpop.eup %2529  ;;  %v1467_v44 = vsel %vm1336_vm6, %v3113_v23, 0.0  ;;  %v1418_v3 = vsub.f32 %v3077_v41, %v1381_v19  ;;  %v1404_v31 = vmax.f32 %v1402_v54, %v1403_v48  ;;  %v1393_v9 = vmax.f32 %v1391_v20, %v1392_v21 }
 0x2b7   : > { %v3125_v39 = vpop.eup %2531  ;;  %v1468_v33 = vadd.f32 %v1467_v44, %v1466_v26  ;;  %v1457_v34 = vsel %vm1336_vm6, %v3120_v29, 0.0  ;;  %v1445_v61 = vmul.f32 1.442695, %v1419_v4  ;;  %v1447_v51 = vmul.f32 1.442695, %v1420_v27 }
 0x2b8   : > { %v1458_v8 = vsel %vm1336_vm6, %v3125_v39, 0.0  ;;  %v1441_v16 = vmul.f32 1.442695, %v1417_v28  ;;  %v1443_v52 = vmul.f32 1.442695, %v1418_v3  ;;  %v1405_v53 = vrot.slane %v1404_v31, 2 }
 0x2b9   : > { %v1469_v42 = vrot.slane %v1468_v33, 4  ;;  %v1459_v49 = vadd.f32 %v1458_v8, %v1457_v34  ;;  %2541 = vpow2.f32 %v1445_v61  ;;  %v1394_v41 = vrot.slane %v1393_v9, 4 }
 0x2ba   : > { %2543 = vpow2.f32 %v1447_v51  ;;  %v1406_v55 = vmax.f32 %v1404_v31, %v1405_v53 }
 0x2bb   : > { %v1470_v56 = vadd.f32 %v1469_v42, %v1468_v33  ;;  %v1460_v37 = vrot.slane %v1459_v49, 4  ;;  %2545 = vpow2.f32 %v1441_v16  ;;  %v1395_v57 = vmax.f32 %v1393_v9, %v1394_v41 }
 0x2bc   : > { %2547 = vpow2.f32 %v1443_v52  ;;  %v1407_v30 = vrot.slane %v1406_v55, 1 }
 0x2bd   : > { %v3131_v40 = vpop.eup %2533  ;;  %v1471_v58 = vrot.slane %v1470_v56, 2  ;;  %v1461_v59 = vadd.f32 %v1460_v37, %v1459_v49  ;;  %v1396_v60 = vrot.slane %v1395_v57, 2 }
 0x2be   : > { %v3133_v63 = vpop.eup %2535  ;;  %v1484_v0 = vsel %vm1336_vm6, %v3131_v40, 0.0  ;;  %v1408_v1 = vmax.f32 %v1406_v55, %v1407_v30 }
 0x2bf   : > { %v3137_v2 = vpop.eup %2537  ;;  %v1472_v45 = vadd.f32 %v1471_v58, %v1470_v56  ;;  %v1462_v5 = vrot.slane %v1461_v59, 2  ;;  %v1485_v6 = vsel %vm1336_vm6, %v3133_v63, 0.0  ;;  %v1397_v7 = vmax.f32 %v1395_v57, %v1396_v60 }
 0x2c0   : > { %v3141_v35 = vpop.eup %2539  ;;  %v1486_v10 = vadd.f32 %v1485_v6, %v1484_v0  ;;  %v1475_v11 = vsel %vm1336_vm6, %v3137_v2, 0.0  ;;  %v1423_v12 = vsub.f32 %v3085_v38, %v1408_v1  ;;  %v1424_v47 = vsub.f32 %v3099_v32, %v1408_v1 }
 0x2c1   : > { %v1473_v13 = vrot.slane %v1472_v45, 1  ;;  %v1476_v14 = vsel %vm1336_vm6, %v3141_v35, 0.0  ;;  %v1398_v43 = vrot.slane %v1397_v7, 1  ;;  %v1463_v15 = vadd.f32 %v1462_v5, %v1461_v59 }
 0x2c2   : > { %v1487_v50 = vrot.slane %v1486_v10, 4  ;;  %v1477_v17 = vadd.f32 %v1476_v14, %v1475_v11  ;;  %v1453_v18 = vmul.f32 1.442695, %v1423_v12  ;;  %v1455_v24 = vmul.f32 1.442695, %v1424_v47 }
 0x2c3   : > { %v1474_v54 = vadd.f32 %v1473_v13, %v1472_v45  ;;  %v1399_v62 = vmax.f32 %v1397_v7, %v1398_v43  ;;  %v1464_v19 = vrot.slane %v1463_v15, 1 }
 0x2c4   : > { %v1488_v20 = vadd.f32 %v1487_v50, %v1486_v10  ;;  %v1478_v48 = vrot.slane %v1477_v17, 4  ;;  %2549 = vpow2.f32 %v1453_v18 }
 0x2c5   : > { %2551 = vrcp.f32 %v1474_v54  ;;  %v1421_v38 = vsub.f32 %v3096_v25, %v1399_v62  ;;  %v1422_v32 = vsub.f32 %v3105_v36, %v1399_v62  ;;  %v1465_v21 = vadd.f32 %v1464_v19, %v1463_v15 }
 0x2c6   : > { %v3151_v26 = vpop.eup %2541  ;;  %v1489_v4 = vrot.slane %v1488_v20, 2  ;;  %v1479_v27 = vadd.f32 %v1478_v48, %v1477_v17  ;;  %2553 = vpow2.f32 %v1455_v24 }
 0x2c7   : > { %v3153_v28 = vpop.eup %2543  ;;  %v1502_v44 = vsel %vm1336_vm6, %v3151_v26, 0.0  ;;  %v1449_v3 = vmul.f32 1.442695, %v1421_v38  ;;  %v1451_v31 = vmul.f32 1.442695, %v1422_v32  ;;  %2555 = vrcp.f32 %v1465_v21 }
 0x2c8   : > { %v3157_v9 = vpop.eup %2545  ;;  %v1480_v33 = vrot.slane %v1479_v27, 2  ;;  %v1503_v25 = vsel %vm1336_vm6, %v3153_v28, 0.0  ;;  %v1490_v36 = vadd.f32 %v1489_v4, %v1488_v20 }
 0x2c9   : > { %v3161_v34 = vpop.eup %2547  ;;  %v1504_v61 = vadd.f32 %v1503_v25, %v1502_v44  ;;  %v1493_v51 = vsel %vm1336_vm6, %v3157_v9, 0.0  ;;  %2557 = vpow2.f32 %v1449_v3 }
 0x2ca   : > { %v1494_v8 = vsel %vm1336_vm6, %v3161_v34, 0.0  ;;  %2559 = vpow2.f32 %v1451_v31  ;;  %v1481_v16 = vadd.f32 %v1480_v33, %v1479_v27  ;;  %v1491_v52 = vrot.slane %v1490_v36, 1 }
 0x2cb   : > { %v1505_v53 = vrot.slane %v1504_v61, 4  ;;  %v1495_v42 = vadd.f32 %v1494_v8, %v1493_v51 }
 0x2cc   : > { %v1482_v49 = vrot.slane %v1481_v16, 1  ;;  %v1492_v41 = vadd.f32 %v1491_v52, %v1490_v36 }
 0x2cd   : > { %v1506_v55 = vadd.f32 %v1505_v53, %v1504_v61  ;;  %v1496_v56 = vrot.slane %v1495_v42, 4 }
 0x2ce   : > { %v1483_v37 = vadd.f32 %v1482_v49, %v1481_v16  ;;  %2561 = vrcp.f32 %v1492_v41 }
 0x2cf   : > { %v1507_v57 = vrot.slane %v1506_v55, 2  ;;  %v1497_v30 = vadd.f32 %v1496_v56, %v1495_v42 }
 0x2d0   : > { %2563 = vrcp.f32 %v1483_v37 }
 0x2d1   : > { %v3167_v58 = vpop.eup %2549  ;;  %v1498_v59 = vrot.slane %v1497_v30, 2  ;;  %v1508_v60 = vadd.f32 %v1507_v57, %v1506_v55 }
 0x2d2   : > { %v2552_v0 = vpop.eup %2551  ;;  %v1520_v1 = vsel %vm1336_vm6, %v3167_v58, 0.0 }
 0x2d3   : > { %v2554_v45 = vpop.eup %2553  ;;  %v1499_v5 = vadd.f32 %v1498_v59, %v1497_v30  ;;  %v1509_v6 = vrot.slane %v1508_v60, 1  ;;  %v1539_v11 = vmul.f32 %v2552_v0, %v3107_v46  ;;  %v1540_v12 = vmul.f32 %v2552_v0, %v3113_v23  ;;  %v2577_v59 = vld [vmem:[%s2819_s29 + $0x10] ss:$8 sps:$4 sm:$0xff]  }
 0x2d4   : > { %v2556_v7 = vpop.eup %2555  ;;  %v1521_v10 = vsel %vm1336_vm6, %v2554_v45, 0.0  ;;  %1761 = vrot.lane.b32.xlu1 %v2577_v59, %s2680_s22 }
 0x2d5   : > { %v1522_v47 = vadd.f32 %v1521_v10, %v1520_v1  ;;  %v1537_v13 = vmul.f32 %v2556_v7, %v3120_v29  ;;  %v1538_v14 = vmul.f32 %v2556_v7, %v3125_v39  ;;  %v1500_v15 = vrot.slane %v1499_v5, 1 }
 0x2d6   : > { %v2558_v43 = vpop.eup %2557  ;;  %v1510_v50 = vadd.f32 %v1509_v6, %v1508_v60  ;;  %v1554_v19 = vpack.c.bf16 %v1540_v12, %v1539_v11 }
 0x2d7   : > { %v2560_v17 = vpop.eup %2559  ;;  %v1523_v18 = vrot.slane %v1522_v47, 4  ;;  %v1511_v24 = vsel %vm1336_vm6, %v2558_v43, 0.0  ;;  %v1553_v54 = vpack.c.bf16 %v1538_v14, %v1537_v13  ;;  %v1501_v20 = vadd.f32 %v1500_v15, %v1499_v5 }
 0x2d8   : > { %v1512_v62 = vsel %vm1336_vm6, %v2560_v17, 0.0  ;;  %2565 = vrcp.f32 %v1510_v50 }
 0x2d9   : > { %v1524_v46 = vadd.f32 %v1523_v18, %v1522_v47  ;;  %v1513_v23 = vadd.f32 %v1512_v62, %v1511_v24  ;;  %2361 = vmatprep.mubr.msk.bf16.mxu0 %vm1336_vm6, %v1553_v54  ;;  %2567 = vrcp.f32 %v1501_v20 }
 0x2da   : > { %2362 = vmatmul.mubr.msk.bf16.vlgmr.msra.gmra.mxu0 %vm1336_vm6, %v1554_v19 }
 0x2db   : > { %v2562_v29 = vpop.eup %2561  ;;  %v1525_v39 = vrot.slane %v1524_v46, 2  ;;  %v1514_v48 = vrot.slane %v1513_v23, 4 }
 0x2dc   : > { %v1543_v21 = vmul.f32 %v2562_v29, %v3131_v40  ;;  %v1544_v4 = vmul.f32 %v2562_v29, %v3133_v63 }
 0x2dd   : > { %v2564_v38 = vpop.eup %2563  ;;  %v1515_v32 = vadd.f32 %v1514_v48, %v1513_v23  ;;  %v1526_v27 = vadd.f32 %v1525_v39, %v1524_v46 }
 0x2de   : > { %v1541_v44 = vmul.f32 %v2564_v38, %v3137_v2  ;;  %v1542_v3 = vmul.f32 %v2564_v38, %v3141_v35  ;;  %v1556_v36 = vpack.c.bf16 %v1544_v4, %v1543_v21 }
 0x2df   : > { %v1516_v31 = vrot.slane %v1515_v32, 2  ;;  %v1527_v33 = vrot.slane %v1526_v27, 1 }
 0x2e0   : > { %v1555_v25 = vpack.c.bf16 %v1542_v3, %v1541_v44 }
 0x2e1   : > { %v1517_v61 = vadd.f32 %v1516_v31, %v1515_v32  ;;  %v1528_v51 = vadd.f32 %v1527_v33, %v1526_v27 }
 0x2e2   : > { %2365 = vmatprep.mubr.msk.bf16.mxu0 %vm1336_vm6, %v1555_v25 }
 0x2e3   : > { %2366 = vmatmul.mubr.msk.bf16.gmra.mxu0 %vm1336_vm6, %v1556_v36  ;;  %v1518_v8 = vrot.slane %v1517_v61, 1  ;;  %2569 = vrcp.f32 %v1528_v51 }
 0x2e5   : > { %v2566_v40 = vpop.eup %2565  ;;  %v1519_v16 = vadd.f32 %v1518_v8, %v1517_v61 }
 0x2e6   : > { %v2568_v63 = vpop.eup %2567  ;;  %v1547_v52 = vmul.f32 %v2566_v40, %v3151_v26  ;;  %v1548_v2 = vmul.f32 %v2566_v40, %v3153_v28 }
 0x2e7   : > { %2571 = vrcp.f32 %v1519_v16  ;;  %v1545_v35 = vmul.f32 %v2568_v63, %v3157_v9  ;;  %v1546_v53 = vmul.f32 %v2568_v63, %v3161_v34  ;;  %v3197_v9 = vpop.f32.mrf.mxu0 }
 0x2e8   : > { %v1558_v49 = vpack.c.bf16 %v1548_v2, %v1547_v52 }
 0x2e9   : > { %v1557_v42 = vpack.c.bf16 %v1546_v53, %v1545_v35  ;;  %v3199_v34 = vpop.f32.mrf.mxu0 }
 0x2eb   : > { %2369 = vmatprep.mubr.msk.bf16.mxu0 %vm1336_vm6, %v1557_v42  ;;  %v2326_v60 = vpop.f32.mrf.mxu0 }
 0x2ec   : > { %2370 = vmatmul.mubr.msk.bf16.gmra.mxu0 %vm1336_vm6, %v1558_v49 }
 0x2ed   : > { %v879_v0 = vpop.f32.mrf.mxu0 }
 0x2ef   : > { %v2329_v1 = vpop.f32.mrf.mxu0 }
 0x2f0   : > { %v2570_v41 = vpop.eup %2569 }
 0x2f1   : > { %v1551_v56 = vmul.f32 %v2570_v41, %v3167_v58  ;;  %v1552_v26 = vmul.f32 %v2570_v41, %v2554_v45  ;;  %v2578_v58 = vld [vmem:[%s2819_s29] ss:$8 sps:$4 sm:$0xff]   ;;  %v892_v45 = vpop.f32.mrf.mxu0 }
 0x2f2   : > { %1759 = vrot.lane.b32.xlu0 %v2578_v58, %s2680_s22  ;;  %v2184_v58 = vld [vmem:[%s2829_s12] ss:$0 sm:$0xff] }
 0x2f3   : > { %v1560_v30 = vpack.c.bf16 %v1552_v26, %v1551_v56  ;;  %v2330_v5 = vpop.f32.mrf.mxu0  ;;  %v1711_v26 = vld [vmem:[%s3315_s5] sm:$0xf] }
 0x2f4   : > { %v2572_v55 = vpop.eup %2571 }
 0x2f5   : > { %v1549_v37 = vmul.f32 %v2572_v55, %v2558_v43  ;;  %v1550_v28 = vmul.f32 %v2572_v55, %v2560_v17  ;;  %v895_v6 = vpop.f32.mrf.mxu0 }
 0x2f7   : > { %v1559_v57 = vpack.c.bf16 %v1550_v28, %v1549_v37  ;;  %v2333_v7 = vpop.f32.mrf.mxu0 }
 0x2f9   : > { %2373 = vmatprep.mubr.msk.bf16.mxu0 %vm1336_vm6, %v1559_v57  ;;  %v908_v10 = vpop.f32.mrf.mxu0 }
 0x2fa   : > { %2374 = vmatmul.mubr.msk.bf16.gmra.mxu0 %vm1336_vm6, %v1560_v30 }
 0x2fb   : > { %2421 = vmatprep.mubr.msk.bf16.mxu0 %vm2677_vm4, %v2676_v22  ;;  %v2334_v11 = vpop.f32.mrf.mxu0 }
 0x2fd   : > { %v911_v12 = vpop.f32.mrf.mxu0 }
 0x2ff   : > { %v2337_v47 = vpop.f32.mrf.mxu0 }
 0x301   : > { %v924_v13 = vpop.f32.mrf.mxu0 }
 0x303   : > { %v2338_v14 = vpop.f32.mrf.mxu0 }
 0x305   : > { %v927_v43 = vpop.f32.mrf.mxu0 }
 0x346   : > { %v1762_v37 = vpop.permute.xlu1 %1761 }
 0x364   : > { %v1760_v28 = vpop.permute.xlu0 %1759 }
 0x39a   : > { %v2363_v15 = vpop.f32.mrf.mxu0 }
 0x39b   : > { %v1689_v42 = vmul.f32 %v2363_v15, %v3197_v9  ;;  %v2520_v15 = vld [vmem:[%s2819_s29 + $0x4] ss:$8 sps:$4 sm:$0xff]  }
 0x39c   : > { %v1624_v50 = vpop.f32.mrf.mxu0 }
 0x39d   : > { %v1687_v55 = vmul.f32 %v1624_v50, %v3199_v34 }
 0x39e   : > { %v2364_v17 = vpop.f32.mrf.mxu0 }
 0x39f   : > { %v1690_v35 = vmul.f32 %v2364_v17, %v2326_v60 }
 0x3a0   : > { %v1627_v18 = vpop.f32.mrf.mxu0 }
 0x3a1   : > { %v1704_v49 = vpack.c.bf16 %v1690_v35, %v1689_v42  ;;  %v1688_v41 = vmul.f32 %v1627_v18, %v879_v0 }
 0x3a3   : > { %v2367_v24 = vpop.f32.mrf.mxu0  ;;  %v1703_v56 = vpack.c.bf16 %v1688_v41, %v1687_v55 }
 0x3a4   : > { %v1693_v16 = vmul.f32 %v2367_v24, %v2329_v1 }
 0x3a5   : > { %v1640_v54 = vpop.f32.mrf.mxu0 }
 0x3a6   : > { %v1691_v2 = vmul.f32 %v1640_v54, %v892_v45  ;;  %v2579_v45 = vld [vmem:[%s2836_s18] sm:$0xff] }
 0x3a7   : > { %v2368_v62 = vpop.f32.mrf.mxu0 }
 0x3a8   : > { %v1694_v8 = vmul.f32 %v2368_v62, %v2330_v5 }
 0x3a9   : > { %v1643_v19 = vpop.f32.mrf.mxu0 }
 0x3aa   : > { %v1706_v63 = vpack.c.bf16 %v1694_v8, %v1693_v16  ;;  %v1692_v52 = vmul.f32 %v1643_v19, %v895_v6 }
 0x3ac   : > { %v2371_v20 = vpop.f32.mrf.mxu0  ;;  %v1705_v53 = vpack.c.bf16 %v1692_v52, %v1691_v2 }
 0x3ad   : > { %v1697_v25 = vmul.f32 %v2371_v20, %v2333_v7 }
 0x3ae   : > { %v1656_v46 = vpop.f32.mrf.mxu0 }
 0x3af   : > { %v1695_v51 = vmul.f32 %v1656_v46, %v908_v10 }
 0x3b0   : > { %v2372_v23 = vpop.f32.mrf.mxu0 }
 0x3b1   : > { %v1698_v31 = vmul.f32 %v2372_v23, %v2334_v11 }
 0x3b2   : > { %v1659_v29 = vpop.f32.mrf.mxu0 }
 0x3b3   : > { %v1708_v36 = vpack.c.bf16 %v1698_v31, %v1697_v25  ;;  %v1696_v61 = vmul.f32 %v1659_v29, %v911_v12  ;;  %v2521_v29 = vld [vmem:[%s2824_s13 + $0x18] sm:$0xff]  }
 0x3b4   : > { %2414 = vmatpush3.bf16.msra.mxu0 %v2521_v29 }
 0x3b5   : > { %v1707_v40 = vpack.c.bf16 %v1696_v61, %v1695_v51  ;;  %2415 = vmatprep.subr.bf16.mxu0 %v2676_v22 }
 0x3ba   : > { %v2375_v39 = vpop.f32.mrf.mxu0 }
 0x3bb   : > { %v1701_v32 = vmul.f32 %v2375_v39, %v2337_v47  ;;  %v2522_v39 = vld [vmem:[%s2824_s13 + $0x10] sm:$0xff]  }
 0x3bc   : > { %v1672_v48 = vpop.f32.mrf.mxu0  ;;  %2416 = vmatpush3.bf16.msra.mxu0 %v2522_v39 }
 0x3bd   : > { %v1699_v3 = vmul.f32 %v1672_v48, %v924_v13  ;;  %2417 = vmatprep.subr.bf16.mxu0 %v2676_v22  ;;  %v2523_v48 = vld [vmem:[%s2824_s13 + $0x8] sm:$0xff]  }
 0x3be   : > { %v2376_v38 = vpop.f32.mrf.mxu0 }
 0x3bf   : > { %v1702_v21 = vmul.f32 %v2376_v38, %v2338_v14  ;;  %v2524_v38 = vld [vmem:[%s2824_s13] sm:$0xff]  }
 0x3c0   : > { %v1675_v4 = vpop.f32.mrf.mxu0  ;;  %2418 = vmatpush3.bf16.msra.mxu0 %v2523_v48 }
 0x3c1   : > { %v1710_v27 = vpack.c.bf16 %v1702_v21, %v1701_v32  ;;  %v1700_v44 = vmul.f32 %v1675_v4, %v927_v43  ;;  %v2519_v43 = vld [vmem:[%s2819_s29 + $0x14] ss:$8 sps:$4 sm:$0xff]   ;;  %2419 = vmatprep.subr.bf16.mxu0 %v2676_v22  ;;  %v2186_v32 = vld [vmem:[%s2829_s12 + $0x1] ss:$0 sm:$0xff]  ;;  %s2196_s29 = sshll.u32 %s2660_s17, 7  ;;  %s1998_s12 = sshll.u32 %s2836_s18, 4  ;;  %s3256_s12 = int_to_ptr.vmem [resolvable:$true] %s1998_s12 }
 0x3c2   : > { %s3254_s30 = scalar_lea.hbm %s3347_s26, %s2196_s29  ;;  %s3348_s17 = sand.u32 1, %s2648_s14  }
 0x3c3   : > { %2378 = vmatpush3.bf16.msra.mxu1 %v1710_v27  ;;  %v1709_v33 = vpack.c.bf16 %v1700_v44, %v1699_v3  ;;  %s1985_s11 = scalar_lea.sflag [#allocation3], %s3348_s17  ;;  %p2587_p5 = scmp.lt.s32.totalorder %s3256_s12, %s2585_s28 }
 0x3c4   : > { %2379 = vmatprep.subr.bf16.mxu1 %v2676_v22  ;;  %2420 = vmatpush3.bf16.msra.mxu0 %v2524_v38 }
 0x3c7   : > { %2380 = vmatpush3.bf16.msra.mxu1 %v1709_v33 }
 0x3c8   : > { %2381 = vmatprep.subr.bf16.mxu1 %v2676_v22 }
 0x3cb   : > { %2382 = vmatpush3.bf16.msra.mxu1 %v1708_v36 }
 0x3cc   : > { %2383 = vmatprep.subr.bf16.mxu1 %v2676_v22 }
 0x3cf   : > { %2384 = vmatpush3.bf16.msra.mxu1 %v1707_v40 }
 0x3d0   : > { %2385 = vmatprep.subr.bf16.mxu1 %v2676_v22 }
 0x3d3   : > { %2386 = vmatpush3.bf16.msra.mxu1 %v1706_v63 }
 0x3d4   : > { %2387 = vmatprep.subr.bf16.mxu1 %v2676_v22 }
 0x3d7   : > { %2388 = vmatpush3.bf16.msra.mxu1 %v1705_v53 }
 0x3d8   : > { %2389 = vmatprep.subr.bf16.mxu1 %v2676_v22 }
 0x3db   : > { %2390 = vmatpush3.bf16.msra.mxu1 %v1704_v49 }
 0x3dc   : > { %2391 = vmatprep.subr.bf16.mxu1 %v2676_v22 }
 0x3df   : > { %2392 = vmatpush3.bf16.msra.mxu1 %v1703_v56 }
 0x3e0   : > { %2397 = vmatprep.subr.bf16.mxu1 %v2676_v22 }
 0x3e2   : > { %2394 = vmatmul.mubr.bf16.vlgmr.msra.gmra.mxu1 %v1711_v26 }
 0x3e3   : > { %2398 = vmatpush3.bf16.msra.mxu1 %v1762_v37  ;;  %2401 = vmatprep.mubr.msk.bf16.mxu1 %vm2677_vm4, %v2676_v22 }
 0x3e4   : > { %2399 = vmatprep.subr.bf16.mxu1 %v2676_v22 }
 0x3e7   : > { %2400 = vmatpush3.bf16.msra.mxu1 %v1760_v28 }
 0x3e8   : > { %2405 = vmatprep.subr.bf16.mxu1 %v2676_v22 }
 0x4a2   : > { %v1746_v57 = vpop.f32.mrf.mxu1 }
 0x4a3   : > { %v1752_v30 = vpack.c.bf16 %v1746_v57, %v1746_v57 }
 0x4a4   : > { %v2395_v9 = vpop.f32.mrf.mxu1 }
 0x4a5   : > { %2402 = vmatmul.mubr.msk.bf16.vlgmr.msra.gmra.mxu1 %vm666_vm3, %v1752_v30 }
 0x4a6   : > { %v1749_v34 = vpop.f32.mrf.mxu1  ;;  %2409 = vmatprep.mubr.msk.bf16.mxu1 %vm2677_vm4, %v2676_v22  ;;  %2406 = vmatpush3.bf16.msra.mxu1 %v2519_v43 }
 0x4a7   : > { %2407 = vmatprep.subr.bf16.mxu1 %v2676_v22 }
 0x4a8   : > { %v2396_v59 = vpop.f32.mrf.mxu1 }
 0x4aa   : > { %2408 = vmatpush3.bf16.msra.mxu1 %v2520_v15 }
 0x565   : > { %v1802_v60 = vpop.f32.mrf.mxu1 }
 0x566   : > { %v1803_v0 = vadd.f32 %v2184_v58, %v1802_v60 }
 0x567   : > { %v2403_v1 = vpop.f32.mrf.mxu1 }
 0x568   : > { %v3227_v5 = vadd.f32 %v2579_v45, %v1803_v0 }
 0x569   : > { %v1805_v6 = vpop.f32.mrf.mxu1 }
 0x56a   : > { %v1809_v7 = vsel %vm666_vm3, %v3227_v5, 0.0 }
 0x56b   : > { %1810 = vadd.xlane.f32.xlu1 %v1809_v7  ;;  %v2404_v10 = vpop.f32.mrf.mxu1 }
 0x57c   : > { %1827 = vrot.lane.b32.xlu1 %v2184_v58, %s2678_s21  ;;  %s2580_s21 = scalar_lea.vmem %s3256_s12, 128 }
 0x57d   : > { %p2581_p1 = scmp.ne.s32.totalorder %s3256_s12, %s2580_s21  ;;  %p2588_p6 = scmp.lt.s32.totalorder %s2586_s24, %s2580_s21 }
 0x57f   : > { %p2582_p2 = pnand %p2581_p1, %p2786_p3  ;;  %p2589_p7 = por %p2588_p6, %p2587_p5 }
 0x580   : > { %1935 = vrot.lane.b32.xlu1 %v2184_v58, %s2680_s22 }
 0x581   : > { %p2583_p4 = pneg %p2582_p2 }
 0x583   : > { %p2590_p8 = pnand %p2589_p7, %p2583_p4 }
 0x5f4   : > { %v1811_v11 = vpop.xlane.xlu1 %1810 }
 0x5f5   : > { %v1813_v12 = vmul.f32 0.03125, %v1811_v11 }
 0x5f7   : > { %v1814_v47 = vsub.f32 %v3227_v5, %v1813_v12 }
 0x5f8   : > { %v1828_v19 = vpop.permute.xlu1 %1827 }
 0x5f9   : > { %v1815_v13 = vmul.f32 %v1814_v47, %v1814_v47 }
 0x5fb   : > { %v1816_v14 = vsel %vm666_vm3, %v1815_v13, 0.0 }
 0x5fc   : > { %1817 = vadd.xlane.f32.xlu0 %v1816_v14  ;;  %v1936_v63 = vpop.permute.xlu1 %1935 }
 0x612   : > { %1823 = vrot.lane.b32.xlu0 %v2184_v58, %s2675_s23 }
 0x685   : > { %v1818_v50 = vpop.xlane.xlu0 %1817 }
 0x686   : > { %v1819_v17 = vmul.f32 0.03125, %v1818_v50 }
 0x688   : > { %v1820_v18 = vadd.f32 1e-05, %v1819_v17 }
 0x689   : > { %v1824_v54 = vpop.permute.xlu0 %1823 }
 0x68a   : > { %2573 = vrsqrt.f32 %v1820_v18 }
 0x697   : > { %v2574_v24 = vpop.eup %2573 }
 0x698   : > { %v1822_v62 = vmul.f32 %v2574_v24, %v1814_v47 }
 0x69a   : > { %v1826_v20 = vmul.f32 %v1824_v54, %v1822_v62 }
 0x69c   : > { %v1830_v46 = vadd.f32 %v1828_v19, %v1826_v20 }
 0x69e   : > { %v1831_v23 = vpack.c.bf16 %v1830_v46, %v1830_v46 }
 0x6a0   : > { %2410 = vmatmul.mubr.msk.bf16.vlgmr.msra.gmra.mxu1 %vm666_vm3, %v1831_v23 }
 0x760   : > { %v1887_v21 = vpop.f32.mrf.mxu1 }
 0x761   : > { %v1888_v4 = vadd.f32 %v2186_v32, %v1887_v21 }
 0x762   : > { %v2411_v27 = vpop.f32.mrf.mxu1 }
 0x763   : > { %v1894_v44 = vmul.f32 0.044715, %v1888_v4  ;;  %v1893_v8 = vmul.f32 0.5, %v1888_v4 }
 0x764   : > { %v1890_v3 = vpop.f32.mrf.mxu1 }
 0x765   : > { %v1895_v31 = vmul.f32 %v1894_v44, %v1888_v4 }
 0x766   : > { %v2412_v33 = vpop.f32.mrf.mxu1 }
 0x767   : > { %v1896_v25 = vmul.f32 %v1895_v31, %v1888_v4 }
 0x769   : > { %v1897_v36 = vadd.f32 %v1896_v25, %v1888_v4 }
 0x76b   : > { %v1898_v61 = vmul.f32 0.7978846, %v1897_v36 }
 0x76d   : > { %2575 = vtanh.f32 %v1898_v61 }
 0x77a   : > { %v2576_v51 = vpop.eup %2575 }
 0x77b   : > { %v1900_v22 = vadd.f32 1.0, %v2576_v51 }
 0x77d   : > { %v1901_v40 = vmul.f32 %v1900_v22, %v1893_v8 }
 0x77f   : > { %v1902_v16 = vpack.c.bf16 %v1901_v40, %v1901_v40 }
 0x781   : > { %2422 = vmatmul.mubr.msk.bf16.vlgmr.msra.gmra.mxu0 %vm1938_vm7, %v1902_v16 }
 0x841   : > { %v1976_v52 = vpop.f32.mrf.mxu0 }
 0x842   : > { %v1977_v2 = vadd.f32 %v1976_v52, %v1936_v63 }
 0x843   : > { %v2423_v35 = vpop.f32.mrf.mxu0 }
 0x844   : > { %v1982_v53 = vadd.f32 %v1977_v2, %v3227_v5 }
 0x845   : > { %v1979_v42 = vpop.f32.mrf.mxu0 }
 0x846   : > { %1983 = vst.msk [vmem:[%s2836_s18] sm:$0xff] %vm666_vm3, %v1982_v53 }
 0x847   : > { %v2424_v49 = vpop.f32.mrf.mxu0 }
 0x848   : > { %2593 = shalt.err (!%p2590_p8)
}
 0x849   : > { %s2594_s18 = scalar_lea.hbm %s3254_s30, 128  ;;  %s2598_s16 = scalar_lea.hbm %s3347_s26, 256 }
 0x84a   : > { %p2595_p10 = scmp.ne.s32.totalorder %s3254_s30, %s2594_s18  ;;  %p2599_p13 = scmp.lt.s32.totalorder %s3254_s30, %s3347_s26 }
 0x84b   : > { %p2600_p0 = scmp.lt.s32.totalorder %s2598_s16, %s2594_s18 }
 0x84c   : > { %p2596_p11 = pnand %p2595_p10, %p2786_p3 }
 0x84d   : > { %p2601_p1 = por %p2600_p0, %p2599_p13 }
 0x84e   : > { %p2597_p12 = pneg %p2596_p11 }
 0x850   : > { %p2602_p2 = pnand %p2601_p1, %p2597_p12 }
 0x852   : > { %2605 = shalt.err (!%p2602_p2)
}
 0x853   : > { %2427 = dma.vmem_to_hbm [thread:$0]  (%p2786_p3), %s3256_s12, 128, %s3254_s30, %s1985_s11  }
 0x854 PF: > { %s3349_s20 = sld [smem:[#allocation9_spill]] }
 0x855   : > { %s3350_s29 = sld [smem:[#allocation5_spill]] }
 0x85a   : > { %p2433_p4 = scmp.ge.s32.totalorder %s3349_s20, 2 }
 0x85b   : > { %s2010_s25 = sand.u32 1, %s3350_s29  }
 0x85c   : > { %p2430_p5 = pnand %p2433_p4, %p2796_p9  ;;  %s2011_s17 = scalar_lea.sflag [#allocation3], %s2010_s25 }
 0x85e   : > { %p2431_p6 = pneg %p2430_p5 }
 0x860   : > { %2639 = dma.done.wait (%p2431_p6), %s2011_s17, 128  }
 0x861   : > { %2641 = vsyncadd (%p2431_p6), %s2011_s17, 4294967168  ;;  %s23_s20 = sadd.s32 1, %s3349_s20   ;;  %s3352_s21 = sld [smem:[#allocation6_spill]] }
 0x862   : > { %p20_p7 = scmp.ge.s32.totalorder %s23_s20, 6   ;;  %s3353_s15 = sld [smem:[#allocation14_spill]] }
 0x863   : > { %s3354_s16 = sld [smem:[#allocation7_spill]]  ;;  %s3358_s13 = smov %s2648_s14 }
 0x864   : > { %s3355_s17 = sld [smem:[#allocation8_spill]]  ;;  %22 = sbr.rel (!%p20_p7) target bundleno = 7 (0x7), region = 111 }
 0x865   : > { %s3356_s18 = sld [smem:[#allocation10_spill]] }
 0x866   : > { %s3357_s19 = sld [smem:[#allocation12_spill]] }
 0x867   : > { %s3359_s14 = smov %s3352_s21 }
 0x869   :  { %2016 = vsyncpa [#allocation3], 1 }
 0x86a   :  { %2018 = vsyncpa [#allocation3 + $0x1], 1 }

</bundles_post_ra>
